<compile_context>
chip_gen: v7x
topology: tpu7x:2x2x1
jax: 0.10.0
libtpu: 0.0.40
codegen_flags: <defaults>
</compile_context>

<pallas_src>
import math
from typing import NamedTuple

import jax
import jax.numpy as jnp
import numpy as np
from jax.experimental import pallas as pl
from jax.experimental.pallas import tpu as pltpu

EMBED_DIMS = 128
SH_DEGREE = 4
OUTPUT_DIM = 10 + 1 + 3 * (SH_DEGREE + 1) ** 2      # 86 (include_opa, include_shs, return_shs)
OUT_PAD = 128                                        # lane-dense padding of the head output
N_REFINE = 11                                        # refine_shs=False -> range(10 + include_opa)
VEC_ROWS = 16                                        # packed per-channel params, padded to 16 rows
SHIFT = 6.0
OPA_SHIFT = 0.05
LN_EPS = 1e-5
SIG_CLAMP = 9.21                                     # safe_sigmoid = sigmoid(clamp(x, -9.21, 9.21))


class Gaussian(NamedTuple):
    means: jax.Array
    scales: jax.Array
    rotations: jax.Array
    opacities: jax.Array
    harmonics: jax.Array
    covariances: jax.Array


def _safe_sigmoid(x):
    return jax.nn.sigmoid(jnp.clip(x, -SIG_CLAMP, SIG_CLAMP))


def _mlp_head(x, w1, w2, w3, w4, w5, vecs):
    """linear_relu_ln(128, 2, 2) + head Linear(128->86 padded to 128) + Scale.

    `w*` may be VMEM refs or plain arrays (both support `[...]`), so the same body
    is used by the kernels and by the pure-JAX reference.  Matmul operands are bf16
    with f32 MXU accumulation; bias / ReLU / LayerNorm run in f32.
    `vecs` rows: 0:b1 1:b2 2:ln1_g 3:ln1_b 4:b3 5:b4 6:ln2_g 7:ln2_b 8:b5 9:scale.
    """
    b1, b2, g1, be1, b3, b4, g2, be2, b5, scl = (vecs[i:i + 1] for i in range(10))

    def lin_relu(h, w, b):
        y = jnp.dot(h.astype(jnp.bfloat16), w[...],
                    preferred_element_type=jnp.float32) + b
        return jnp.maximum(y, 0.0)

    def layer_norm(h, g, be):
        mu = jnp.mean(h, axis=-1, keepdims=True)
        c = h - mu                                    # centered (two-pass) variance
        var = jnp.mean(c * c, axis=-1, keepdims=True)
        return c * jax.lax.rsqrt(var + LN_EPS) * g + be

    h = lin_relu(x, w1, b1)
    h = lin_relu(h, w2, b2)
    h = layer_norm(h, g1, be1)
    h = lin_relu(h, w3, b3)
    h = lin_relu(h, w4, b4)
    h = layer_norm(h, g2, be2)
    return (jnp.dot(h.astype(jnp.bfloat16), w5[...],
                    preferred_element_type=jnp.float32) + b5) * scl


def _refine_fused_kernel(inst_ref, emb_ref, anchor_ref,
                         w1, w2, w3, w4, w5, vec_ref,
                         off_ref, opa_ref):
    """Single-launch path (grid=(1,)): MLP + head + the whole refinement epilogue.

    Emits only what the returned Gaussian consumes: per-row xyz offsets (N,3) and
    the opacity offset (N,1)."""
    vecs = vec_ref[...]                                       # (16, 128) f32, one DMA
    x = inst_ref[...] + emb_ref[...]                          # f32 activations
    head = _mlp_head(x, w1, w2, w3, w4, w5, vecs)             # (N, 128) f32
    anchor = anchor_ref[...].astype(jnp.float32)              # (N, 86)

    # refine_state = range(11): output[..., :11] += anchor[..., :11]; only cols
    # 0:3 (xyz) and 10 (opacity) feed the returned Gaussian.
    xyz = _safe_sigmoid(head[:, 0:3] + anchor[:, 0:3])        # (N, 3)
    opa = _safe_sigmoid(head[:, 10:11] + anchor[:, 10:11])    # (N, 1)

    # torch: d = xyz.norm(-1, keepdim=True) -> p=-1 norm over ALL xyz elements
    # (a single scalar): (sum 1/|x|)^(-1); xyz is strictly positive (sigmoid).
    inv_sum = jnp.sum(jnp.sum(1.0 / xyz, axis=-1, keepdims=True),
                      axis=0, keepdims=True)                  # (1, 1)
    d = 1.0 / inv_sum
    fac = (jnp.exp(d - SHIFT) - math.exp(-SHIFT)) / jnp.maximum(d, 1e-8)
    off_ref[...] = xyz * fac                                  # (N, 3)
    opa_ref[...] = OPA_SHIFT * opa                            # (N, 1)


def _refine_head_kernel(inst_ref, emb_ref, w1, w2, w3, w4, w5, vec_ref, out_ref):
    """Streaming path (grid > 1): MLP + head only; bf16 activations in, bf16 head out."""
    x = inst_ref[...] + emb_ref[...]                          # bf16 add
    out_ref[...] = _mlp_head(x, w1, w2, w3, w4, w5, vec_ref[...]).astype(out_ref.dtype)


def _pick_stream_tile(n):
    """Largest row tile that divides n with >= 2 grid steps; prefer an even step
    count so dimension_semantics=("parallel",) actually splits across v7x's 2 TCs."""
    best = None
    for t in (4096, 2048, 1024, 512, 256, 128, 64, 32, 16, 8):
        if n % t == 0 and n // t >= 2:
            if best is None:
                best = t
            if (n // t) % 2 == 0:
                return t
    if best is None:
        raise ValueError(f"N={n} must be a multiple of 8")
    return best


def init_params(key):
    """f32 master parameters (layout: x @ W + b, i.e. W is (din, dout))."""
    def dense(k, din, dout):
        kw, kb = jax.random.split(k)
        w = jax.random.normal(kw, (din, dout), jnp.float32) / math.sqrt(din)
        b = jax.random.normal(kb, (dout,), jnp.float32) * 0.01
        return w, b

    ks = jax.random.split(key, 5)
    w1, b1 = dense(ks[0], EMBED_DIMS, EMBED_DIMS)
    w2, b2 = dense(ks[1], EMBED_DIMS, EMBED_DIMS)
    w3, b3 = dense(ks[2], EMBED_DIMS, EMBED_DIMS)
    w4, b4 = dense(ks[3], EMBED_DIMS, EMBED_DIMS)
    w5, b5 = dense(ks[4], EMBED_DIMS, OUTPUT_DIM)
    ones_d = jnp.ones((EMBED_DIMS,), jnp.float32)
    zeros_d = jnp.zeros((EMBED_DIMS,), jnp.float32)
    return dict(w1=w1, b1=b1, w2=w2, b2=b2, g1=ones_d, be1=zeros_d,
                w3=w3, b3=b3, w4=w4, b4=b4, g2=ones_d, be2=zeros_d,
                w5=w5, b5=b5, scale=jnp.ones((OUTPUT_DIM,), jnp.float32))


def pack_params(p):
    """One-time kernel packing (hoisted out of the per-call path):
      * weights pre-cast to bf16; w5 zero-padded to 128 output lanes,
      * the ten per-channel vectors packed into ONE (16, 128) f32 array."""
    bf16 = jnp.bfloat16

    def row(v):
        v = v.astype(jnp.float32)
        return jnp.zeros((EMBED_DIMS,), jnp.float32).at[: v.shape[0]].set(v)

    rows = [row(p[k]) for k in ("b1", "b2", "g1", "be1", "b3", "b4", "g2", "be2",
                                "b5", "scale")]
    rows += [jnp.zeros((EMBED_DIMS,), jnp.float32)] * (VEC_ROWS - len(rows))
    vecs = jnp.stack(rows)                                    # (16, 128) f32
    w5 = jnp.zeros((EMBED_DIMS, OUT_PAD), jnp.float32).at[:, :OUTPUT_DIM].set(p["w5"])
    return dict(w1=p["w1"].astype(bf16), w2=p["w2"].astype(bf16),
                w3=p["w3"].astype(bf16), w4=p["w4"].astype(bf16),
                w5=w5.astype(bf16), vecs=vecs)


def forward(kparams, instance_feature, anchor, anchor_embed, gaussians, anchor_idxs,
            *, fused_rows_max=1024):
    N, D = instance_feature.shape
    assert D == EMBED_DIMS
    f32, bf16 = jnp.float32, jnp.bfloat16

    # Resident weights: same block every step (default double-buffering kept; see header).
    weight_specs = [
        pl.BlockSpec((EMBED_DIMS, EMBED_DIMS), lambda i: (0, 0)),
        pl.BlockSpec((EMBED_DIMS, EMBED_DIMS), lambda i: (0, 0)),
        pl.BlockSpec((EMBED_DIMS, EMBED_DIMS), lambda i: (0, 0)),
        pl.BlockSpec((EMBED_DIMS, EMBED_DIMS), lambda i: (0, 0)),
        pl.BlockSpec((EMBED_DIMS, OUT_PAD), lambda i: (0, 0)),
        pl.BlockSpec((VEC_ROWS, EMBED_DIMS), lambda i: (0, 0)),
    ]
    weight_args = (kparams["w1"], kparams["w2"], kparams["w3"], kparams["w4"],
                   kparams["w5"], kparams["vecs"])

    if N <= fused_rows_max:
        # Launch-overhead-bound regime: one kernel does MLP + head + scalar epilogue.
        offsets, opa_col = pl.pallas_call(
            _refine_fused_kernel,
            grid=(1,),
            in_specs=[pl.BlockSpec((N, EMBED_DIMS), lambda i: (0, 0)),
                      pl.BlockSpec((N, EMBED_DIMS), lambda i: (0, 0)),
                      pl.BlockSpec((N, anchor.shape[-1]), lambda i: (0, 0))]
                     + weight_specs,
            out_specs=(pl.BlockSpec((N, 3), lambda i: (0, 0)),
                       pl.BlockSpec((N, 1), lambda i: (0, 0))),
            out_shape=(jax.ShapeDtypeStruct((N, 3), f32),
                       jax.ShapeDtypeStruct((N, 1), f32)),
            compiler_params=pltpu.CompilerParams(dimension_semantics=("arbitrary",)),
        )(instance_feature.astype(f32), anchor_embed.astype(f32), anchor.astype(f32),
          *weight_args)
        opa_off = opa_col[:, 0]
    else:
        # HBM-streaming regime: bf16 activations in / bf16 lane-dense head out,
        # >= 2 grid steps (even count -> v7x megacore); scalar epilogue in XLA
        # because the p=-1 norm couples all rows.
        tile = _pick_stream_tile(N)
        head = pl.pallas_call(
            _refine_head_kernel,
            grid=(N // tile,),
            in_specs=[pl.BlockSpec((tile, EMBED_DIMS), lambda i: (i, 0)),
                      pl.BlockSpec((tile, EMBED_DIMS), lambda i: (i, 0))]
                     + weight_specs,
            out_specs=pl.BlockSpec((tile, OUT_PAD), lambda i: (i, 0)),
            out_shape=jax.ShapeDtypeStruct((N, OUT_PAD), bf16),
            compiler_params=pltpu.CompilerParams(
                dimension_semantics=("parallel",),
                vmem_limit_bytes=32 * 1024 * 1024),
        )(instance_feature.astype(bf16), anchor_embed.astype(bf16), *weight_args)

        refined = head[:, :N_REFINE].astype(f32) + anchor[:, :N_REFINE].astype(f32)
        xyz = _safe_sigmoid(refined[:, 0:3])
        opa = _safe_sigmoid(refined[:, 10])
        d = 1.0 / jnp.sum(1.0 / xyz)
        offsets = xyz * ((jnp.exp(d - SHIFT) - math.exp(-SHIFT)) / jnp.maximum(d, 1e-8))
        opa_off = OPA_SHIFT * opa

    # Scatter into the Gaussian (anchor_idxs unique, as the torch scatter-assign assumes).
    means = gaussians.means.at[anchor_idxs].add(offsets)
    opacities = gaussians.opacities.at[anchor_idxs].add(opa_off)
    return Gaussian(means=means, scales=gaussians.scales, rotations=gaussians.rotations,
                    opacities=opacities, harmonics=gaussians.harmonics,
                    covariances=gaussians.covariances)


def _reference_forward(kparams, instance_feature, anchor, anchor_embed, gaussians,
                       anchor_idxs, *, streaming=False):
    """Pure-JAX mirror of the kernel math (same bf16-operand recipe) for tolerance tests."""
    f32, bf16 = jnp.float32, jnp.bfloat16
    if streaming:
        x = instance_feature.astype(bf16) + anchor_embed.astype(bf16)
    else:
        x = instance_feature.astype(f32) + anchor_embed.astype(f32)
    head = _mlp_head(x, kparams["w1"], kparams["w2"], kparams["w3"], kparams["w4"],
                     kparams["w5"], kparams["vecs"])
    if streaming:
        head = head.astype(bf16).astype(f32)                  # kernel stores head as bf16
    refined = head[:, :N_REFINE] + anchor[:, :N_REFINE].astype(f32)
    xyz = _safe_sigmoid(refined[:, 0:3])
    opa = _safe_sigmoid(refined[:, 10])
    d = 1.0 / jnp.sum(1.0 / xyz)
    offsets = xyz * ((jnp.exp(d - SHIFT) - math.exp(-SHIFT)) / jnp.maximum(d, 1e-8))
    means = gaussians.means.at[anchor_idxs].add(offsets)
    opacities = gaussians.opacities.at[anchor_idxs].add(OPA_SHIFT * opa)
    return Gaussian(means=means, scales=gaussians.scales, rotations=gaussians.rotations,
                    opacities=opacities, harmonics=gaussians.harmonics,
                    covariances=gaussians.covariances)


def _check(out, ref, gaussians, idxs):
    off_k = np.asarray(out.means[idxs] - gaussians.means[idxs])
    off_r = np.asarray(ref.means[idxs] - gaussians.means[idxs])
    np.testing.assert_allclose(off_k, off_r, rtol=5e-2, atol=1e-5)
    opa_k = np.asarray(out.opacities[idxs] - gaussians.opacities[idxs])
    opa_r = np.asarray(ref.opacities[idxs] - gaussians.opacities[idxs])
    np.testing.assert_allclose(opa_k, opa_r, rtol=5e-2, atol=5e-4)


if __name__ == "__main__":
    key = jax.random.PRNGKey(0)
    k_par, k_if, k_an, k_ae, k_g, k_idx, k_big = jax.random.split(key, 7)
    params = init_params(k_par)
    kparams = pack_params(params)                             # one-time bf16 cast / packing
    kparams = jax.tree_util.tree_map(jax.block_until_ready, kparams)

    def make_gaussians(k, g):
        km, ks, kr, ko, kh, kc = jax.random.split(k, 6)
        return Gaussian(
            means=jax.random.normal(km, (g, 3), jnp.float32),
            scales=jax.random.uniform(ks, (g, 3), jnp.float32),
            rotations=jax.random.normal(kr, (g, 4), jnp.float32),
            opacities=jax.random.uniform(ko, (g,), jnp.float32),
            harmonics=jax.random.normal(kh, (g, 3, (SH_DEGREE + 1) ** 2), jnp.float32),
            covariances=jax.random.normal(kc, (g, 3, 3), jnp.float32),
        )

    fwd = jax.jit(forward)

    # --- shipped case: N=64 -> fused single-launch kernel -------------------------------
    N, G = 64, 256
    instance_feature = jax.random.normal(k_if, (N, EMBED_DIMS), jnp.float32)
    anchor = jax.random.normal(k_an, (N, OUTPUT_DIM), jnp.float32) * 0.1
    anchor_embed = jax.random.normal(k_ae, (N, EMBED_DIMS), jnp.float32)
    gaussians = make_gaussians(k_g, G)
    anchor_idxs = jax.random.permutation(k_idx, G)[:N]

    out = fwd(kparams, instance_feature, anchor, anchor_embed, gaussians, anchor_idxs)
    out = jax.tree_util.tree_map(jax.block_until_ready, out)
    ref = _reference_forward(kparams, instance_feature, anchor, anchor_embed,
                             gaussians, anchor_idxs)
    _check(out, ref, gaussians, anchor_idxs)

    # --- large-N case: exercises the bf16 streaming path (grid > 1) ---------------------
    N2, G2 = 2048, 4096
    kb = jax.random.split(k_big, 6)
    inst2 = jax.random.normal(kb[0], (N2, EMBED_DIMS), jnp.float32)
    anch2 = jax.random.normal(kb[1], (N2, OUTPUT_DIM), jnp.float32) * 0.1
    emb2 = jax.random.normal(kb[2], (N2, EMBED_DIMS), jnp.float32)
    gaussians2 = make_gaussians(kb[3], G2)
    idxs2 = jax.random.permutation(kb[4], G2)[:N2]

    out2 = fwd(kparams, inst2, anch2, emb2, gaussians2, idxs2)
    out2 = jax.tree_util.tree_map(jax.block_until_ready, out2)
    ref2 = _reference_forward(kparams, inst2, anch2, emb2, gaussians2, idxs2,
                              streaming=True)
    _check(out2, ref2, gaussians2, idxs2)

    print("KERNEL_OK")
</pallas_src>

<mosaic_0001>
module attributes {stable_mosaic.version = 11 : i64} {
  func.func private @main(%arg0: i32) attributes {dimension_semantics = [#tpu.dimension_semantics<core_parallel>], iteration_bounds = array<i64: 2>, tpu.core_type = #tpu.core_type<sc_scalar_subcore>, window_params = []} {
    return
  }
}

module attributes {stable_mosaic.version = 11 : i64} {
  func.func private @main(%arg0: i32) attributes {dimension_semantics = [#tpu.dimension_semantics<core_parallel>], iteration_bounds = array<i64: 2>, tpu.core_type = #tpu.core_type<sc_scalar_subcore>, window_params = []} {
    return
  }
}

module attributes {stable_mosaic.version = 11 : i64} {
  func.func @_refine_fused_kernel(%arg0: i32, %arg1: memref<64x128xf32, #tpu.memory_space<vmem>>, %arg2: memref<64x128xf32, #tpu.memory_space<vmem>>, %arg3: memref<64x86xf32, #tpu.memory_space<vmem>>, %arg4: memref<128x128xbf16, #tpu.memory_space<vmem>>, %arg5: memref<128x128xbf16, #tpu.memory_space<vmem>>, %arg6: memref<128x128xbf16, #tpu.memory_space<vmem>>, %arg7: memref<128x128xbf16, #tpu.memory_space<vmem>>, %arg8: memref<128x128xbf16, #tpu.memory_space<vmem>>, %arg9: memref<16x128xf32, #tpu.memory_space<vmem>>, %arg10: memref<64x3xf32, #tpu.memory_space<vmem>>, %arg11: memref<64x1xf32, #tpu.memory_space<vmem>>) attributes {dimension_semantics = [#tpu.dimension_semantics<arbitrary>], iteration_bounds = array<i64: 1>, scalar_prefetch = 0 : i64, scratch_operands = 0 : i64, tpu.core_type = #tpu.core_type<tc>, window_params = [{pipeline_mode = #tpu.pipeline_mode<synchronous>, transform_indices = @transform_0, window_bounds = array<i64: 64, 128>}, {pipeline_mode = #tpu.pipeline_mode<synchronous>, transform_indices = @transform_1, window_bounds = array<i64: 64, 128>}, {pipeline_mode = #tpu.pipeline_mode<synchronous>, transform_indices = @transform_2, window_bounds = array<i64: 64, 86>}, {pipeline_mode = #tpu.pipeline_mode<synchronous>, transform_indices = @transform_3, window_bounds = array<i64: 128, 128>}, {pipeline_mode = #tpu.pipeline_mode<synchronous>, transform_indices = @transform_4, window_bounds = array<i64: 128, 128>}, {pipeline_mode = #tpu.pipeline_mode<synchronous>, transform_indices = @transform_5, window_bounds = array<i64: 128, 128>}, {pipeline_mode = #tpu.pipeline_mode<synchronous>, transform_indices = @transform_6, window_bounds = array<i64: 128, 128>}, {pipeline_mode = #tpu.pipeline_mode<synchronous>, transform_indices = @transform_7, window_bounds = array<i64: 128, 128>}, {pipeline_mode = #tpu.pipeline_mode<synchronous>, transform_indices = @transform_8, window_bounds = array<i64: 16, 128>}, {pipeline_mode = #tpu.pipeline_mode<synchronous>, transform_indices = @transform_9, window_bounds = array<i64: 64, 3>}, {pipeline_mode = #tpu.pipeline_mode<synchronous>, transform_indices = @transform_10, window_bounds = array<i64: 64, 1>}]} {
    %c0 = arith.constant 0 : index
    %c0_0 = arith.constant 0 : index
    %0 = vector.load %arg9[%c0, %c0_0] : memref<16x128xf32, #tpu.memory_space<vmem>>, vector<16x128xf32>
    %c0_1 = arith.constant 0 : index
    %c0_2 = arith.constant 0 : index
    %1 = vector.load %arg1[%c0_1, %c0_2] : memref<64x128xf32, #tpu.memory_space<vmem>>, vector<64x128xf32>
    %c0_3 = arith.constant 0 : index
    %c0_4 = arith.constant 0 : index
    %2 = vector.load %arg2[%c0_3, %c0_4] : memref<64x128xf32, #tpu.memory_space<vmem>>, vector<64x128xf32>
    %3 = arith.addf %1, %2 : vector<64x128xf32>
    %4 = vector.extract_strided_slice %0 {offsets = [0, 0], sizes = [1, 128], strides = [1, 1]} : vector<16x128xf32> to vector<1x128xf32>
    %5 = vector.extract_strided_slice %0 {offsets = [1, 0], sizes = [1, 128], strides = [1, 1]} : vector<16x128xf32> to vector<1x128xf32>
    %6 = vector.extract_strided_slice %0 {offsets = [2, 0], sizes = [1, 128], strides = [1, 1]} : vector<16x128xf32> to vector<1x128xf32>
    %7 = vector.extract_strided_slice %0 {offsets = [3, 0], sizes = [1, 128], strides = [1, 1]} : vector<16x128xf32> to vector<1x128xf32>
    %8 = vector.extract_strided_slice %0 {offsets = [4, 0], sizes = [1, 128], strides = [1, 1]} : vector<16x128xf32> to vector<1x128xf32>
    %9 = vector.extract_strided_slice %0 {offsets = [5, 0], sizes = [1, 128], strides = [1, 1]} : vector<16x128xf32> to vector<1x128xf32>
    %10 = vector.extract_strided_slice %0 {offsets = [6, 0], sizes = [1, 128], strides = [1, 1]} : vector<16x128xf32> to vector<1x128xf32>
    %11 = vector.extract_strided_slice %0 {offsets = [7, 0], sizes = [1, 128], strides = [1, 1]} : vector<16x128xf32> to vector<1x128xf32>
    %12 = vector.extract_strided_slice %0 {offsets = [8, 0], sizes = [1, 128], strides = [1, 1]} : vector<16x128xf32> to vector<1x128xf32>
    %13 = vector.extract_strided_slice %0 {offsets = [9, 0], sizes = [1, 128], strides = [1, 1]} : vector<16x128xf32> to vector<1x128xf32>
    %14 = arith.truncf %3 : vector<64x128xf32> to vector<64x128xbf16>
    %c0_5 = arith.constant 0 : index
    %c0_6 = arith.constant 0 : index
    %15 = vector.load %arg4[%c0_5, %c0_6] : memref<128x128xbf16, #tpu.memory_space<vmem>>, vector<128x128xbf16>
    %cst = arith.constant dense<0.000000e+00> : vector<64x128xf32>
    %16 = tpu.matmul %14, %15, %cst {dimension_numbers = #tpu.dot_dimension_numbers<[1], [0], [0], [1], [0, 0, 1, 1], [], []>} : vector<64x128xbf16>, vector<128x128xbf16>, vector<64x128xf32> -> vector<64x128xf32>
    %17 = vector.broadcast %4 : vector<1x128xf32> to vector<64x128xf32>
    %18 = arith.addf %16, %17 : vector<64x128xf32>
    %cst_7 = arith.constant 0.000000e+00 : f32
    %19 = vector.broadcast %cst_7 : f32 to vector<64x128xf32>
    %20 = arith.maximumf %18, %19 : vector<64x128xf32>
    %21 = arith.truncf %20 : vector<64x128xf32> to vector<64x128xbf16>
    %c0_8 = arith.constant 0 : index
    %c0_9 = arith.constant 0 : index
    %22 = vector.load %arg5[%c0_8, %c0_9] : memref<128x128xbf16, #tpu.memory_space<vmem>>, vector<128x128xbf16>
    %cst_10 = arith.constant dense<0.000000e+00> : vector<64x128xf32>
    %23 = tpu.matmul %21, %22, %cst_10 {dimension_numbers = #tpu.dot_dimension_numbers<[1], [0], [0], [1], [0, 0, 1, 1], [], []>} : vector<64x128xbf16>, vector<128x128xbf16>, vector<64x128xf32> -> vector<64x128xf32>
    %24 = vector.broadcast %5 : vector<1x128xf32> to vector<64x128xf32>
    %25 = arith.addf %23, %24 : vector<64x128xf32>
    %cst_11 = arith.constant 0.000000e+00 : f32
    %26 = vector.broadcast %cst_11 : f32 to vector<64x128xf32>
    %27 = arith.maximumf %25, %26 : vector<64x128xf32>
    %cst_12 = arith.constant dense<0.000000e+00> : vector<64xf32>
    %28 = vector.multi_reduction <add>, %27, %cst_12 [1] : vector<64x128xf32> to vector<64xf32>
    %29 = vector.shape_cast %28 : vector<64xf32> to vector<64x1xf32>
    %cst_13 = arith.constant 1.280000e+02 : f32
    %30 = vector.broadcast %cst_13 : f32 to vector<64x1xf32>
    %31 = arith.divf %29, %30 : vector<64x1xf32>
    %32 = vector.broadcast %31 : vector<64x1xf32> to vector<64x128xf32>
    %33 = arith.subf %27, %32 : vector<64x128xf32>
    %34 = arith.mulf %33, %33 : vector<64x128xf32>
    %cst_14 = arith.constant dense<0.000000e+00> : vector<64xf32>
    %35 = vector.multi_reduction <add>, %34, %cst_14 [1] : vector<64x128xf32> to vector<64xf32>
    %36 = vector.shape_cast %35 : vector<64xf32> to vector<64x1xf32>
    %cst_15 = arith.constant 1.280000e+02 : f32
    %37 = vector.broadcast %cst_15 : f32 to vector<64x1xf32>
    %38 = arith.divf %36, %37 : vector<64x1xf32>
    %cst_16 = arith.constant 9.99999974E-6 : f32
    %39 = vector.broadcast %cst_16 : f32 to vector<64x1xf32>
    %40 = arith.addf %38, %39 : vector<64x1xf32>
    %41 = math.rsqrt %40 : vector<64x1xf32>
    %42 = vector.broadcast %41 : vector<64x1xf32> to vector<64x128xf32>
    %43 = arith.mulf %33, %42 : vector<64x128xf32>
    %44 = vector.broadcast %6 : vector<1x128xf32> to vector<64x128xf32>
    %45 = arith.mulf %43, %44 : vector<64x128xf32>
    %46 = vector.broadcast %7 : vector<1x128xf32> to vector<64x128xf32>
    %47 = arith.addf %45, %46 : vector<64x128xf32>
    %48 = arith.truncf %47 : vector<64x128xf32> to vector<64x128xbf16>
    %c0_17 = arith.constant 0 : index
    %c0_18 = arith.constant 0 : index
    %49 = vector.load %arg6[%c0_17, %c0_18] : memref<128x128xbf16, #tpu.memory_space<vmem>>, vector<128x128xbf16>
    %cst_19 = arith.constant dense<0.000000e+00> : vector<64x128xf32>
    %50 = tpu.matmul %48, %49, %cst_19 {dimension_numbers = #tpu.dot_dimension_numbers<[1], [0], [0], [1], [0, 0, 1, 1], [], []>} : vector<64x128xbf16>, vector<128x128xbf16>, vector<64x128xf32> -> vector<64x128xf32>
    %51 = vector.broadcast %8 : vector<1x128xf32> to vector<64x128xf32>
    %52 = arith.addf %50, %51 : vector<64x128xf32>
    %cst_20 = arith.constant 0.000000e+00 : f32
    %53 = vector.broadcast %cst_20 : f32 to vector<64x128xf32>
    %54 = arith.maximumf %52, %53 : vector<64x128xf32>
    %55 = arith.truncf %54 : vector<64x128xf32> to vector<64x128xbf16>
    %c0_21 = arith.constant 0 : index
    %c0_22 = arith.constant 0 : index
    %56 = vector.load %arg7[%c0_21, %c0_22] : memref<128x128xbf16, #tpu.memory_space<vmem>>, vector<128x128xbf16>
    %cst_23 = arith.constant dense<0.000000e+00> : vector<64x128xf32>
    %57 = tpu.matmul %55, %56, %cst_23 {dimension_numbers = #tpu.dot_dimension_numbers<[1], [0], [0], [1], [0, 0, 1, 1], [], []>} : vector<64x128xbf16>, vector<128x128xbf16>, vector<64x128xf32> -> vector<64x128xf32>
    %58 = vector.broadcast %9 : vector<1x128xf32> to vector<64x128xf32>
    %59 = arith.addf %57, %58 : vector<64x128xf32>
    %cst_24 = arith.constant 0.000000e+00 : f32
    %60 = vector.broadcast %cst_24 : f32 to vector<64x128xf32>
    %61 = arith.maximumf %59, %60 : vector<64x128xf32>
    %cst_25 = arith.constant dense<0.000000e+00> : vector<64xf32>
    %62 = vector.multi_reduction <add>, %61, %cst_25 [1] : vector<64x128xf32> to vector<64xf32>
    %63 = vector.shape_cast %62 : vector<64xf32> to vector<64x1xf32>
    %cst_26 = arith.constant 1.280000e+02 : f32
    %64 = vector.broadcast %cst_26 : f32 to vector<64x1xf32>
    %65 = arith.divf %63, %64 : vector<64x1xf32>
    %66 = vector.broadcast %65 : vector<64x1xf32> to vector<64x128xf32>
    %67 = arith.subf %61, %66 : vector<64x128xf32>
    %68 = arith.mulf %67, %67 : vector<64x128xf32>
    %cst_27 = arith.constant dense<0.000000e+00> : vector<64xf32>
    %69 = vector.multi_reduction <add>, %68, %cst_27 [1] : vector<64x128xf32> to vector<64xf32>
    %70 = vector.shape_cast %69 : vector<64xf32> to vector<64x1xf32>
    %cst_28 = arith.constant 1.280000e+02 : f32
    %71 = vector.broadcast %cst_28 : f32 to vector<64x1xf32>
    %72 = arith.divf %70, %71 : vector<64x1xf32>
    %cst_29 = arith.constant 9.99999974E-6 : f32
    %73 = vector.broadcast %cst_29 : f32 to vector<64x1xf32>
    %74 = arith.addf %72, %73 : vector<64x1xf32>
    %75 = math.rsqrt %74 : vector<64x1xf32>
    %76 = vector.broadcast %75 : vector<64x1xf32> to vector<64x128xf32>
    %77 = arith.mulf %67, %76 : vector<64x128xf32>
    %78 = vector.broadcast %10 : vector<1x128xf32> to vector<64x128xf32>
    %79 = arith.mulf %77, %78 : vector<64x128xf32>
    %80 = vector.broadcast %11 : vector<1x128xf32> to vector<64x128xf32>
    %81 = arith.addf %79, %80 : vector<64x128xf32>
    %82 = arith.truncf %81 : vector<64x128xf32> to vector<64x128xbf16>
    %c0_30 = arith.constant 0 : index
    %c0_31 = arith.constant 0 : index
    %83 = vector.load %arg8[%c0_30, %c0_31] : memref<128x128xbf16, #tpu.memory_space<vmem>>, vector<128x128xbf16>
    %cst_32 = arith.constant dense<0.000000e+00> : vector<64x128xf32>
    %84 = tpu.matmul %82, %83, %cst_32 {dimension_numbers = #tpu.dot_dimension_numbers<[1], [0], [0], [1], [0, 0, 1, 1], [], []>} : vector<64x128xbf16>, vector<128x128xbf16>, vector<64x128xf32> -> vector<64x128xf32>
    %85 = vector.broadcast %12 : vector<1x128xf32> to vector<64x128xf32>
    %86 = arith.addf %84, %85 : vector<64x128xf32>
    %87 = vector.broadcast %13 : vector<1x128xf32> to vector<64x128xf32>
    %88 = arith.mulf %86, %87 : vector<64x128xf32>
    %c0_33 = arith.constant 0 : index
    %c0_34 = arith.constant 0 : index
    %89 = vector.load %arg3[%c0_33, %c0_34] : memref<64x86xf32, #tpu.memory_space<vmem>>, vector<64x86xf32>
    %90 = vector.extract_strided_slice %88 {offsets = [0, 0], sizes = [64, 3], strides = [1, 1]} : vector<64x128xf32> to vector<64x3xf32>
    %91 = vector.extract_strided_slice %89 {offsets = [0, 0], sizes = [64, 3], strides = [1, 1]} : vector<64x86xf32> to vector<64x3xf32>
    %92 = arith.addf %90, %91 : vector<64x3xf32>
    %cst_35 = arith.constant -9.210000e+00 : f32
    %cst_36 = arith.constant 9.210000e+00 : f32
    %93 = vector.broadcast %cst_35 : f32 to vector<64x3xf32>
    %94 = arith.maximumf %93, %92 : vector<64x3xf32>
    %95 = vector.broadcast %cst_36 : f32 to vector<64x3xf32>
    %96 = arith.minimumf %95, %94 : vector<64x3xf32>
    %97 = arith.negf %96 : vector<64x3xf32>
    %98 = math.exp %97 : vector<64x3xf32>
    %cst_37 = arith.constant 1.000000e+00 : f32
    %99 = vector.broadcast %cst_37 : f32 to vector<64x3xf32>
    %100 = arith.addf %99, %98 : vector<64x3xf32>
    %101 = arith.divf %99, %100 : vector<64x3xf32>
    %102 = vector.extract_strided_slice %88 {offsets = [0, 10], sizes = [64, 1], strides = [1, 1]} : vector<64x128xf32> to vector<64x1xf32>
    %103 = vector.extract_strided_slice %89 {offsets = [0, 10], sizes = [64, 1], strides = [1, 1]} : vector<64x86xf32> to vector<64x1xf32>
    %104 = arith.addf %102, %103 : vector<64x1xf32>
    %cst_38 = arith.constant -9.210000e+00 : f32
    %cst_39 = arith.constant 9.210000e+00 : f32
    %105 = vector.broadcast %cst_38 : f32 to vector<64x1xf32>
    %106 = arith.maximumf %105, %104 : vector<64x1xf32>
    %107 = vector.broadcast %cst_39 : f32 to vector<64x1xf32>
    %108 = arith.minimumf %107, %106 : vector<64x1xf32>
    %109 = arith.negf %108 : vector<64x1xf32>
    %110 = math.exp %109 : vector<64x1xf32>
    %cst_40 = arith.constant 1.000000e+00 : f32
    %111 = vector.broadcast %cst_40 : f32 to vector<64x1xf32>
    %112 = arith.addf %111, %110 : vector<64x1xf32>
    %113 = arith.divf %111, %112 : vector<64x1xf32>
    %cst_41 = arith.constant 1.000000e+00 : f32
    %114 = vector.broadcast %cst_41 : f32 to vector<64x3xf32>
    %115 = arith.divf %114, %101 : vector<64x3xf32>
    %cst_42 = arith.constant dense<0.000000e+00> : vector<64xf32>
    %116 = vector.multi_reduction <add>, %115, %cst_42 [1] : vector<64x3xf32> to vector<64xf32>
    %117 = vector.shape_cast %116 : vector<64xf32> to vector<64x1xf32>
    %cst_43 = arith.constant dense<0.000000e+00> : vector<1xf32>
    %118 = vector.multi_reduction <add>, %117, %cst_43 [0] : vector<64x1xf32> to vector<1xf32>
    %119 = vector.shape_cast %118 : vector<1xf32> to vector<1x1xf32>
    %cst_44 = arith.constant 1.000000e+00 : f32
    %120 = vector.broadcast %cst_44 : f32 to vector<1x1xf32>
    %121 = arith.divf %120, %119 : vector<1x1xf32>
    %cst_45 = arith.constant 6.000000e+00 : f32
    %122 = vector.broadcast %cst_45 : f32 to vector<1x1xf32>
    %123 = arith.subf %121, %122 : vector<1x1xf32>
    %124 = math.exp %123 : vector<1x1xf32>
    %cst_46 = arith.constant 0.00247875229 : f32
    %125 = vector.broadcast %cst_46 : f32 to vector<1x1xf32>
    %126 = arith.subf %124, %125 : vector<1x1xf32>
    %cst_47 = arith.constant 9.99999993E-9 : f32
    %127 = vector.broadcast %cst_47 : f32 to vector<1x1xf32>
    %128 = arith.maximumf %121, %127 : vector<1x1xf32>
    %129 = arith.divf %126, %128 : vector<1x1xf32>
    %130 = vector.broadcast %129 : vector<1x1xf32> to vector<64x3xf32>
    %131 = arith.mulf %101, %130 : vector<64x3xf32>
    %c0_48 = arith.constant 0 : index
    %c0_49 = arith.constant 0 : index
    %132 = vector.load %arg10[%c0_48, %c0_49] : memref<64x3xf32, #tpu.memory_space<vmem>>, vector<64x3xf32>
    tpu.vector_store %arg10[%c0_48, %c0_49], %131 {strides = array<i32>} : memref<64x3xf32, #tpu.memory_space<vmem>>, vector<64x3xf32>,
    %cst_50 = arith.constant 5.000000e-02 : f32
    %133 = vector.broadcast %cst_50 : f32 to vector<64x1xf32>
    %134 = arith.mulf %133, %113 : vector<64x1xf32>
    %c0_51 = arith.constant 0 : index
    %c0_52 = arith.constant 0 : index
    %135 = vector.load %arg11[%c0_51, %c0_52] : memref<64x1xf32, #tpu.memory_space<vmem>>, vector<64x1xf32>
    tpu.vector_store %arg11[%c0_51, %c0_52], %134 {strides = array<i32>} : memref<64x1xf32, #tpu.memory_space<vmem>>, vector<64x1xf32>,
    return
  }
  func.func @transform_0(%arg0: i32) -> (i32, i32) {
    %c0_i32 = arith.constant 0 : i32
    %c0_i32_0 = arith.constant 0 : i32
    %c0_i32_1 = arith.constant 0 : i32
    return %c0_i32, %c0_i32_0 : i32, i32
  }
  func.func @transform_1(%arg0: i32) -> (i32, i32) {
    %c0_i32 = arith.constant 0 : i32
    %c0_i32_0 = arith.constant 0 : i32
    %c0_i32_1 = arith.constant 0 : i32
    return %c0_i32, %c0_i32_0 : i32, i32
  }
  func.func @transform_2(%arg0: i32) -> (i32, i32) {
    %c0_i32 = arith.constant 0 : i32
    %c0_i32_0 = arith.constant 0 : i32
    %c0_i32_1 = arith.constant 0 : i32
    return %c0_i32, %c0_i32_0 : i32, i32
  }
  func.func @transform_3(%arg0: i32) -> (i32, i32) {
    %c0_i32 = arith.constant 0 : i32
    %c0_i32_0 = arith.constant 0 : i32
    %c0_i32_1 = arith.constant 0 : i32
    return %c0_i32, %c0_i32_0 : i32, i32
  }
  func.func @transform_4(%arg0: i32) -> (i32, i32) {
    %c0_i32 = arith.constant 0 : i32
    %c0_i32_0 = arith.constant 0 : i32
    %c0_i32_1 = arith.constant 0 : i32
    return %c0_i32, %c0_i32_0 : i32, i32
  }
  func.func @transform_5(%arg0: i32) -> (i32, i32) {
    %c0_i32 = arith.constant 0 : i32
    %c0_i32_0 = arith.constant 0 : i32
    %c0_i32_1 = arith.constant 0 : i32
    return %c0_i32, %c0_i32_0 : i32, i32
  }
  func.func @transform_6(%arg0: i32) -> (i32, i32) {
    %c0_i32 = arith.constant 0 : i32
    %c0_i32_0 = arith.constant 0 : i32
    %c0_i32_1 = arith.constant 0 : i32
    return %c0_i32, %c0_i32_0 : i32, i32
  }
  func.func @transform_7(%arg0: i32) -> (i32, i32) {
    %c0_i32 = arith.constant 0 : i32
    %c0_i32_0 = arith.constant 0 : i32
    %c0_i32_1 = arith.constant 0 : i32
    return %c0_i32, %c0_i32_0 : i32, i32
  }
  func.func @transform_8(%arg0: i32) -> (i32, i32) {
    %c0_i32 = arith.constant 0 : i32
    %c0_i32_0 = arith.constant 0 : i32
    %c0_i32_1 = arith.constant 0 : i32
    return %c0_i32, %c0_i32_0 : i32, i32
  }
  func.func @transform_9(%arg0: i32) -> (i32, i32) {
    %c0_i32 = arith.constant 0 : i32
    %c0_i32_0 = arith.constant 0 : i32
    %c0_i32_1 = arith.constant 0 : i32
    return %c0_i32, %c0_i32_0 : i32, i32
  }
  func.func @transform_10(%arg0: i32) -> (i32, i32) {
    %c0_i32 = arith.constant 0 : i32
    %c0_i32_0 = arith.constant 0 : i32
    %c0_i32_1 = arith.constant 0 : i32
    return %c0_i32, %c0_i32_0 : i32, i32
  }
}

</mosaic_0001>

<bundles_post_ra>
// kernel: forward.1
= control target key start
LH: loop header
LB: loop body
LE: loop exit
PB: predicated region body
PF: predicated region fallthrough
CT: control target
= control target key end

     0   :  { %16 = vsyncpa [#allocation3], 0  ;;  %s2247_s0 = inlined_call_operand.vmem [shape: f32[64,128], index: 0, kind: input, shape index: {}]   ;;  %s2248_s1 = inlined_call_operand.vmem [shape: f32[64,128], index: 1, kind: input, shape index: {}]   ;;  %s2249_s2 = inlined_call_operand.vmem [shape: f32[64,86], index: 2, kind: input, shape index: {}]   ;;  %s2250_s3 = inlined_call_operand.vmem [shape: bf16[128,128], index: 3, kind: input, shape index: {}]   ;;  %s2251_s4 = inlined_call_operand.vmem [shape: bf16[128,128], index: 4, kind: input, shape index: {}]   ;;  %s2252_s5 = inlined_call_operand.hbm [shape: bf16[128,128], index: 5, kind: input, shape index: {}]   ;;  %s2253_s6 = inlined_call_operand.hbm [shape: bf16[128,128], index: 6, kind: input, shape index: {}]   ;;  %s2254_s7 = inlined_call_operand.hbm [shape: bf16[128,128], index: 7, kind: input, shape index: {}]   ;;  %s2255_s8 = inlined_call_operand.hbm [shape: f32[16,128], index: 8, kind: input, shape index: {}]   ;;  %s2256_s9 = inlined_call_operand.vmem [shape: f32[64,3], index: 9, kind: output, shape index: {0}]   ;;  %s2257_s10 = inlined_call_operand.vmem [shape: f32[64,1], index: 10, kind: output, shape index: {1}]  }
   0x1   :  { %17 = vsyncpa [#allocation5], 0 }
   0x2   :  { %18 = vsyncpa [#allocation8], 0  ;;  %s1772_s13 = smov [#allocation4]   ;;  %s1773_s15 = smov [#allocation2]  }
   0x3   :  { %s46_s14 = sshll.u32 %s1772_s13, 4  ;;  %s34_s16 = sshll.u32 %s1773_s15, 4  ;;  %s47_s14 = int_to_ptr.vmem [resolvable:$true] %s46_s14  ;;  %s1836_s16 = int_to_ptr.vmem [resolvable:$true] %s34_s16 }
   0x4   :  { %s1678_s19 = scalar_lea.hbm %s2253_s6, 1024 }
   0x5   :  { %p1679_p0 = scmp.ne.s32.totalorder %s2253_s6, %s1678_s19  ;;  %p1682_p1 = scmp.lt.u32.totalorder %s1678_s19, %s2253_s6 }
   0x7   :  { %p1684_p2 = pnand %p1682_p1, %p1679_p0 }
   0x9   :  { %1687 = shalt.err (!%p1684_p2)
}
   0xa   :  { %s1688_s24 = scalar_lea.vmem %s47_s14, 1024  ;;  %p1693_p4 = scmp.lt.s32.totalorder %s47_s14, %s47_s14 }
   0xb   :  { %p1689_p3 = scmp.ne.s32.totalorder %s47_s14, %s1688_s24  ;;  %p1694_p5 = scmp.lt.s32.totalorder %s1688_s24, %s1688_s24 }
   0xd   :  { %p1695_p6 = por %p1694_p5, %p1693_p4 }
   0xf   :  { %p1696_p7 = pnand %p1695_p6, %p1689_p3 }
  0x11   :  { %1699 = shalt.err (!%p1696_p7)
}
  0x12   :  { %s1774_s25 = smov 64   ;;  %s1775_s26 = smov 4  }
  0x13   :  { %52 = dma.hbm_to_vmem [thread:$0]  %s2253_s6, 1024, %s47_s14, [#allocation5], %s1774_s25, %s1774_s25, %s1775_s26  }
  0x14   :  { %s1700_s11 = scalar_lea.hbm %s2252_s5, 1024 }
  0x15   :  { %p1701_p8 = scmp.ne.s32.totalorder %s2252_s5, %s1700_s11  ;;  %p1704_p9 = scmp.lt.u32.totalorder %s1700_s11, %s2252_s5 }
  0x17   :  { %p1706_p10 = pnand %p1704_p9, %p1701_p8 }
  0x19   :  { %1709 = shalt.err (!%p1706_p10)
}
  0x1a   :  { %s1710_s18 = scalar_lea.vmem %s1836_s16, 1024  ;;  %p1715_p12 = scmp.lt.s32.totalorder %s1836_s16, %s1836_s16 }
  0x1b   :  { %p1711_p11 = scmp.ne.s32.totalorder %s1836_s16, %s1710_s18  ;;  %p1716_p13 = scmp.lt.s32.totalorder %s1710_s18, %s1710_s18 }
  0x1d   :  { %p1717_p0 = por %p1716_p13, %p1715_p12 }
  0x1f   :  { %p1718_p1 = pnand %p1717_p0, %p1711_p11 }
  0x21   :  { %1721 = shalt.err (!%p1718_p1)
}
  0x22   :  { %40 = dma.hbm_to_vmem [thread:$0]  %s2252_s5, 1024, %s1836_s16, [#allocation3], %s1774_s25, %s1774_s25, %s1775_s26  }
  0x23   :  { %s1776_s19 = smov [#allocation6]   ;;  %s1777_s21 = smov [#allocation7]  }
  0x24   :  { %s58_s20 = sshll.u32 %s1776_s19, 4  ;;  %s70_s22 = sshll.u32 %s1777_s21, 4  ;;  %s59_s20 = int_to_ptr.vmem [resolvable:$true] %s58_s20  ;;  %s1873_s22 = int_to_ptr.vmem [resolvable:$true] %s70_s22 }
  0x25   :  { %s1722_s27 = scalar_lea.hbm %s2254_s7, 1024 }
  0x26   :  { %p1723_p2 = scmp.ne.s32.totalorder %s2254_s7, %s1722_s27  ;;  %p1726_p3 = scmp.lt.u32.totalorder %s1722_s27, %s2254_s7 }
  0x28   :  { %p1728_p4 = pnand %p1726_p3, %p1723_p2 }
  0x2a   :  { %1731 = shalt.err (!%p1728_p4)
}
  0x2b   :  { %s1732_s5 = scalar_lea.vmem %s59_s20, 1024  ;;  %p1737_p6 = scmp.lt.s32.totalorder %s59_s20, %s59_s20 }
  0x2c   :  { %p1733_p5 = scmp.ne.s32.totalorder %s59_s20, %s1732_s5  ;;  %p1738_p7 = scmp.lt.s32.totalorder %s1732_s5, %s1732_s5 }
  0x2e   :  { %p1739_p8 = por %p1738_p7, %p1737_p6 }
  0x30   :  { %p1740_p9 = pnand %p1739_p8, %p1733_p5 }
  0x32   :  { %1743 = shalt.err (!%p1740_p9)
}
  0x33   :  { %64 = dma.hbm_to_vmem [thread:$0]  %s2254_s7, 1024, %s59_s20, [#allocation5], %s1774_s25, %s1774_s25, %s1775_s26  }
  0x34   :  { %s1744_s17 = scalar_lea.hbm %s2255_s8, 256 }
  0x35   :  { %p1745_p10 = scmp.ne.s32.totalorder %s2255_s8, %s1744_s17  ;;  %p1748_p11 = scmp.lt.u32.totalorder %s1744_s17, %s2255_s8 }
  0x37   :  { %p1750_p12 = pnand %p1748_p11, %p1745_p10 }
  0x39   :  { %1753 = shalt.err (!%p1750_p12)
}
  0x3a   :  { %s1754_s21 = scalar_lea.vmem %s1873_s22, 256  ;;  %p1759_p0 = scmp.lt.s32.totalorder %s1873_s22, %s1873_s22 }
  0x3b   :  { %p1755_p13 = scmp.ne.s32.totalorder %s1873_s22, %s1754_s21  ;;  %p1760_p1 = scmp.lt.s32.totalorder %s1754_s21, %s1754_s21 }
  0x3d   :  { %p1761_p2 = por %p1760_p1, %p1759_p0 }
  0x3f   :  { %p1762_p3 = pnand %p1761_p2, %p1755_p13 }
  0x41   :  { %1765 = shalt.err (!%p1762_p3)
}
  0x42   :  { %s1778_s7 = smov 128   ;;  %s1779_s25 = smov 8  }
  0x43   :  { %76 = dma.hbm_to_vmem [thread:$0]  %s2255_s8, 256, %s1873_s22, [#allocation8], %s1778_s7, %s1778_s7, %s1779_s25  }
  0x44   :  { %1766 = dma.done.wait [#allocation3], 1024  }
  0x45   :  { %1767 = vsyncadd [#allocation3], 4294966272 }
  0x46   :  { %1768 = dma.done.wait [#allocation5], 2048  }
  0x47   :  { %1769 = vsyncadd [#allocation5], 4294965248 }
  0x48   :  { %1770 = dma.done.wait [#allocation8], 256  }
  0x49   :  { %1771 = vsyncadd [#allocation8], 4294967040  ;;  %v1552_v0 = vld [vmem:[%s2250_s3] sm:$0xff]   ;;  %v1553_v1 = vld [vmem:[%s2250_s3 + $0x8] sm:$0xff]   ;;  %v136_v44 = vlaneseq  ;;  %vm1166_vm0 = vcmask 23552   ;;  %vm1269_vm1 = vcmask 7168  }
  0x4a   :  { %1407 = vmatprep.subr.bf16.mxu0 %v1552_v0  ;;  %v1554_v2 = vld [vmem:[%s2250_s3 + $0x10] sm:$0xff]   ;;  %v1555_v3 = vld [vmem:[%s2250_s3 + $0x18] sm:$0xff]   ;;  %v92_v4 = vld [vmem:[%s2247_s0] sm:$0xff] }
  0x4b   :  { %1408 = vmatpush3.bf16.msra.mxu0 %v1552_v0  ;;  %v93_v5 = vld [vmem:[%s2247_s0 + $0x8] sm:$0xff]  ;;  %v100_v6 = vld [vmem:[%s2248_s1] sm:$0xff]  ;;  %v1562_v15 = vld [vmem:[%s2251_s4 + $0x10] sm:$0xff]   ;;  %v2003_v45 = vshrl.u32 %v136_v44, 7 }
  0x4c   :  { %1409 = vmatprep.subr.bf16.mxu0 %v1553_v1  ;;  %v101_v7 = vld [vmem:[%s2248_s1 + $0x8] sm:$0xff]  ;;  %v108_v8 = vadd.f32 %v100_v6, %v92_v4  ;;  %v1556_v10 = vld [vmem:[%s2250_s3 + $0x20] sm:$0xff]   ;;  %v1558_v16 = vld [vmem:[%s2250_s3 + $0x30] sm:$0xff]  }
  0x4d   :  { %v109_v9 = vadd.f32 %v101_v7, %v93_v5  ;;  %v1560_v12 = vld [vmem:[%s2251_s4] sm:$0xff]   ;;  %v1561_v13 = vld [vmem:[%s2251_s4 + $0x8] sm:$0xff]   ;;  %v1563_v17 = vld [vmem:[%s2251_s4 + $0x18] sm:$0xff]   ;;  %v138_v46 = vsub.s32 0, %v2003_v45 }
  0x4e   :  { %v1557_v14 = vld [vmem:[%s2250_s3 + $0x28] sm:$0xff]   ;;  %1431 = vmatprep.subr.bf16.mxu1 %v1560_v12  ;;  %v94_v18 = vld [vmem:[%s2247_s0 + $0x10] sm:$0xff]  ;;  %v95_v19 = vld [vmem:[%s2247_s0 + $0x18] sm:$0xff] }
  0x4f   :  { %1410 = vmatpush3.bf16.msra.mxu0 %v1553_v1  ;;  %v116_v11 = vpack.c.bf16 %v109_v9, %v108_v8  ;;  %1432 = vmatpush3.bf16.msra.mxu1 %v1560_v12  ;;  %v102_v20 = vld [vmem:[%s2248_s1 + $0x10] sm:$0xff]  ;;  %v103_v21 = vld [vmem:[%s2248_s1 + $0x18] sm:$0xff]  ;;  %v96_v23 = vld [vmem:[%s2247_s0 + $0x20] sm:$0xff] }
  0x50   :  { %1411 = vmatprep.subr.bf16.mxu0 %v1554_v2  ;;  %1433 = vmatprep.subr.bf16.mxu1 %v1561_v13  ;;  %v1559_v22 = vld [vmem:[%s2250_s3 + $0x38] sm:$0xff]   ;;  %v97_v24 = vld [vmem:[%s2247_s0 + $0x28] sm:$0xff]  ;;  %v104_v25 = vld [vmem:[%s2248_s1 + $0x20] sm:$0xff]  ;;  %v110_v28 = vadd.f32 %v102_v20, %v94_v18  ;;  %v111_v29 = vadd.f32 %v103_v21, %v95_v19 }
  0x51   :  { %1423 = vmatprep.mubr.bf16.mxu0 %v116_v11  ;;  %v105_v26 = vld [vmem:[%s2248_s1 + $0x28] sm:$0xff]  ;;  %v1564_v27 = vld [vmem:[%s2251_s4 + $0x20] sm:$0xff]   ;;  %v112_v30 = vadd.f32 %v104_v25, %v96_v23  ;;  %v98_v33 = vld [vmem:[%s2247_s0 + $0x30] sm:$0xff] }
  0x52   :  { %v113_v31 = vadd.f32 %v105_v26, %v97_v24  ;;  %v1565_v32 = vld [vmem:[%s2251_s4 + $0x28] sm:$0xff]   ;;  %v99_v34 = vld [vmem:[%s2247_s0 + $0x38] sm:$0xff]  ;;  %v106_v35 = vld [vmem:[%s2248_s1 + $0x30] sm:$0xff]  ;;  %v117_v37 = vpack.c.bf16 %v111_v29, %v110_v28 }
  0x53   :  { %1412 = vmatpush3.bf16.msra.mxu0 %v1554_v2  ;;  %1434 = vmatpush3.bf16.msra.mxu1 %v1561_v13  ;;  %v107_v36 = vld [vmem:[%s2248_s1 + $0x38] sm:$0xff]  ;;  %v114_v39 = vadd.f32 %v106_v35, %v98_v33  ;;  %v1566_v42 = vld [vmem:[%s2251_s4 + $0x30] sm:$0xff]   ;;  %v2006_v47 = vld [vmem:[#allocation7] sm:$0xff]  ;;  %v283_v13 = vsub.s32 1, %v2003_v45 }
  0x54   :  { %1413 = vmatprep.subr.bf16.mxu0 %v1555_v3  ;;  %1435 = vmatprep.subr.bf16.mxu1 %v1562_v15  ;;  %v118_v38 = vpack.c.bf16 %v113_v31, %v112_v30  ;;  %v115_v40 = vadd.f32 %v107_v36, %v99_v34  ;;  %v1567_v43 = vld [vmem:[%s2251_s4 + $0x38] sm:$0xff]   ;;  %v139_v48 = vrot.slane %v2006_v47, %v138_v46 }
  0x56   :  { %v119_v41 = vpack.c.bf16 %v115_v40, %v114_v39  ;;  %v1568_v39 = vld [vmem:[#allocation2] sm:$0xff]  }
  0x57   :  { %1414 = vmatpush3.bf16.msra.mxu0 %v1555_v3  ;;  %1436 = vmatpush3.bf16.msra.mxu1 %v1562_v15 }
  0x58   :  { %1415 = vmatprep.subr.bf16.mxu0 %v1556_v10  ;;  %1437 = vmatprep.subr.bf16.mxu1 %v1563_v17 }
  0x5b   :  { %1416 = vmatpush3.bf16.msra.mxu0 %v1556_v10  ;;  %1438 = vmatpush3.bf16.msra.mxu1 %v1563_v17 }
  0x5c   :  { %1417 = vmatprep.subr.bf16.mxu0 %v1557_v14  ;;  %1439 = vmatprep.subr.bf16.mxu1 %v1564_v27 }
  0x5f   :  { %1418 = vmatpush3.bf16.msra.mxu0 %v1557_v14  ;;  %1440 = vmatpush3.bf16.msra.mxu1 %v1564_v27  ;;  %v284_v14 = vrot.slane %v2006_v47, %v283_v13 }
  0x60   :  { %1419 = vmatprep.subr.bf16.mxu0 %v1558_v16  ;;  %1441 = vmatprep.subr.bf16.mxu1 %v1565_v32 }
  0x63   :  { %1420 = vmatpush3.bf16.msra.mxu0 %v1558_v16  ;;  %1442 = vmatpush3.bf16.msra.mxu1 %v1565_v32 }
  0x64   :  { %1421 = vmatprep.subr.bf16.mxu0 %v1559_v22  ;;  %1443 = vmatprep.subr.bf16.mxu1 %v1566_v42 }
  0x67   :  { %1422 = vmatpush3.bf16.msra.mxu0 %v1559_v22  ;;  %1444 = vmatpush3.bf16.msra.mxu1 %v1566_v42 }
  0x68   :  { %1445 = vmatprep.subr.bf16.mxu1 %v1567_v43  ;;  %1455 = vmatprep.subr.bf16.mxu0 %v1568_v39 }
  0x6a   :  { %1424 = vmatmul.mubr.bf16.vlgmr.msra.gmra.mrb[0].mxu0 %v117_v37 }
  0x6b   :  { %1427 = vmatprep.mubr.bf16.mxu0 %v118_v38  ;;  %1446 = vmatpush3.bf16.msra.mxu1 %v1567_v43 }
  0x6c   :  { %1456 = vmatpush3.bf16.msra.mxu0 %v1568_v39 }
  0x72   :  { %1428 = vmatmul.mubr.bf16.gmra.mrb[4].mxu0 %v119_v41 }
 0x13d   :  { %v1425_v49 = vpop.f32.mrb[0].mxu0 }
 0x13e   :  { %v231_v50 = vadd.f32 %v1425_v49, %v139_v48  ;;  %v222_v51 = vpop.f32.mrb[1].mxu0 }
 0x13f   :  { %v223_v52 = vadd.f32 %v222_v51, %v139_v48  ;;  %v1426_v53 = vpop.f32.mrb[2].mxu0 }
 0x140   :  { %v234_v54 = vadd.f32 %v1426_v53, %v139_v48  ;;  %v225_v55 = vpop.f32.mrb[3].mxu0  ;;  %v255_v57 = vmax.f32 %v231_v50, 0.0 }
 0x141   :  { %v226_v56 = vadd.f32 %v225_v55, %v139_v48  ;;  %v253_v59 = vmax.f32 %v223_v52, 0.0 }
 0x142   :  { %v256_v58 = vmax.f32 %v234_v54, 0.0 }
 0x143   :  { %v254_v60 = vmax.f32 %v226_v56, 0.0 }
 0x144   :  { %v262_v61 = vpack.c.bf16 %v256_v58, %v255_v57 }
 0x145   :  { %v1429_v62 = vpop.f32.mrb[4].mxu0  ;;  %v261_v63 = vpack.c.bf16 %v254_v60, %v253_v59 }
 0x146   :  { %v247_v0 = vadd.f32 %v1429_v62, %v139_v48  ;;  %v238_v1 = vpop.f32.mrb[5].mxu0 }
 0x147   :  { %v239_v2 = vadd.f32 %v238_v1, %v139_v48  ;;  %v1430_v3 = vpop.f32.mrb[6].mxu0  ;;  %1447 = vmatprep.mubr.bf16.mxu1 %v261_v63 }
 0x148   :  { %v259_v4 = vmax.f32 %v247_v0, 0.0  ;;  %v250_v5 = vadd.f32 %v1430_v3, %v139_v48  ;;  %v241_v6 = vpop.f32.mrb[7].mxu0  ;;  %1448 = vmatmul.mubr.bf16.vlgmr.msra.gmra.mrb[0].mxu1 %v262_v61 }
 0x149   :  { %v257_v7 = vmax.f32 %v239_v2, 0.0  ;;  %v242_v8 = vadd.f32 %v241_v6, %v139_v48 }
 0x14a   :  { %v260_v9 = vmax.f32 %v250_v5, 0.0 }
 0x14b   :  { %v258_v10 = vmax.f32 %v242_v8, 0.0 }
 0x14c   :  { %v264_v11 = vpack.c.bf16 %v260_v9, %v259_v4 }
 0x14d   :  { %v263_v12 = vpack.c.bf16 %v258_v10, %v257_v7 }
 0x14f   :  { %1451 = vmatprep.mubr.bf16.mxu1 %v263_v12  ;;  %v1570_v12 = vld [vmem:[#allocation2 + $0x10] sm:$0xff]  }
 0x150   :  { %1452 = vmatmul.mubr.bf16.gmra.mrb[4].mxu1 %v264_v11  ;;  %v1569_v11 = vld [vmem:[#allocation2 + $0x8] sm:$0xff]  }
 0x151   :  { %1457 = vmatprep.subr.bf16.mxu0 %v1569_v11 }
 0x152   :  { %1458 = vmatpush3.bf16.msra.mxu0 %v1569_v11 }
 0x153   :  { %1459 = vmatprep.subr.bf16.mxu0 %v1570_v12 }
 0x156   :  { %1460 = vmatpush3.bf16.msra.mxu0 %v1570_v12 }
 0x21b   :  { %v1449_v15 = vpop.f32.mrb[0].mxu1 }
 0x21c   :  { %v376_v16 = vadd.f32 %v1449_v15, %v284_v14  ;;  %v367_v17 = vpop.f32.mrb[1].mxu1  ;;  %v1572_v15 = vld [vmem:[#allocation2 + $0x20] sm:$0xff]  }
 0x21d   :  { %v368_v18 = vadd.f32 %v367_v17, %v284_v14  ;;  %v1450_v19 = vpop.f32.mrb[2].mxu1  ;;  %v1574_v17 = vld [vmem:[#allocation2 + $0x30] sm:$0xff]  }
 0x21e   :  { %v400_v20 = vmax.f32 %v376_v16, 0.0  ;;  %v379_v21 = vadd.f32 %v1450_v19, %v284_v14  ;;  %v370_v22 = vpop.f32.mrb[3].mxu1  ;;  %v1573_v16 = vld [vmem:[#allocation2 + $0x28] sm:$0xff]   ;;  %v1576_v19 = vld [vmem:[#allocation4] sm:$0xff]  }
 0x21f   :  { %v398_v23 = vmax.f32 %v368_v18, 0.0  ;;  %v371_v24 = vadd.f32 %v370_v22, %v284_v14  ;;  %v1575_v18 = vld [vmem:[#allocation2 + $0x38] sm:$0xff]   ;;  %1479 = vmatprep.subr.bf16.mxu1 %v1576_v19 }
 0x220   :  { %410 = vadd.xlane.f32.xlu1 %v400_v20  ;;  %v401_v25 = vmax.f32 %v379_v21, 0.0  ;;  %1480 = vmatpush3.bf16.msra.mxu1 %v1576_v19  ;;  %v1578_v21 = vld [vmem:[#allocation4 + $0x10] sm:$0xff]   ;;  %v1579_v22 = vld [vmem:[#allocation4 + $0x18] sm:$0xff]  }
 0x221   :  { %406 = vadd.xlane.f32.xlu0 %v398_v23  ;;  %v399_v26 = vmax.f32 %v371_v24, 0.0  ;;  %v1581_v24 = vld [vmem:[#allocation4 + $0x28] sm:$0xff]  }
 0x223   :  { %v1453_v27 = vpop.f32.mrb[4].mxu1 }
 0x224   :  { %412 = vadd.xlane.f32.xlu1 %v401_v25  ;;  %v383_v28 = vpop.f32.mrb[5].mxu1  ;;  %v392_v32 = vadd.f32 %v1453_v27, %v284_v14 }
 0x225   :  { %v384_v29 = vadd.f32 %v383_v28, %v284_v14  ;;  %v1454_v30 = vpop.f32.mrb[6].mxu1  ;;  %408 = vadd.xlane.f32.xlu0 %v399_v26 }
 0x226   :  { %v386_v31 = vpop.f32.mrb[7].mxu1  ;;  %v395_v35 = vadd.f32 %v1454_v30, %v284_v14  ;;  %v404_v37 = vmax.f32 %v392_v32, 0.0 }
 0x227   :  { %v402_v33 = vmax.f32 %v384_v29, 0.0  ;;  %v387_v34 = vadd.f32 %v386_v31, %v284_v14  ;;  %v1571_v14 = vld [vmem:[#allocation2 + $0x18] sm:$0xff]  }
 0x228   :  { %v405_v38 = vmax.f32 %v395_v35, 0.0  ;;  %1461 = vmatprep.subr.bf16.mxu0 %v1571_v14 }
 0x229   :  { %v403_v36 = vmax.f32 %v387_v34, 0.0  ;;  %414 = vadd.xlane.f32.xlu0 %v402_v33  ;;  %1462 = vmatpush3.bf16.msra.mxu0 %v1571_v14 }
 0x22a   :  { %1463 = vmatprep.subr.bf16.mxu0 %v1572_v15 }
 0x22b   :  { %416 = vadd.xlane.f32.xlu1 %v403_v36 }
 0x22d   :  { %418 = vadd.xlane.f32.xlu0 %v404_v37  ;;  %1464 = vmatpush3.bf16.msra.mxu0 %v1572_v15 }
 0x22e   :  { %1465 = vmatprep.subr.bf16.mxu0 %v1573_v16 }
 0x22f   :  { %420 = vadd.xlane.f32.xlu1 %v405_v38 }
 0x231   :  { %1466 = vmatpush3.bf16.msra.mxu0 %v1573_v16 }
 0x232   :  { %1467 = vmatprep.subr.bf16.mxu0 %v1574_v17 }
 0x235   :  { %1468 = vmatpush3.bf16.msra.mxu0 %v1574_v17 }
 0x236   :  { %1469 = vmatprep.subr.bf16.mxu0 %v1575_v18 }
 0x239   :  { %1470 = vmatpush3.bf16.msra.mxu0 %v1575_v18 }
 0x2ad   :  { %v411_v40 = vpop.xlane.xlu1 %410 }
 0x2ae   :  { %v407_v41 = vpop.xlane.xlu0 %406  ;;  %v425_v42 = vmul.f32 0.0078125, %v411_v40  ;;  %v497_v40 = vsub.s32 2, %v2003_v45 }
 0x2af   :  { %v423_v43 = vmul.f32 0.0078125, %v407_v41 }
 0x2b0   :  { %v2017_v50 = vsub.f32 %v400_v20, %v425_v42  ;;  %v1577_v20 = vld [vmem:[#allocation4 + $0x8] sm:$0xff]  }
 0x2b1   :  { %v2015_v44 = vsub.f32 %v398_v23, %v423_v43  ;;  %v413_v48 = vpop.xlane.xlu1 %412  ;;  %1481 = vmatprep.subr.bf16.mxu1 %v1577_v20  ;;  %v1580_v23 = vld [vmem:[#allocation4 + $0x20] sm:$0xff]  }
 0x2b2   :  { %v409_v49 = vpop.xlane.xlu0 %408  ;;  %v426_v51 = vmul.f32 0.0078125, %v413_v48  ;;  %v441_v58 = vmul.f32 %v2017_v50, %v2017_v50  ;;  %1482 = vmatpush3.bf16.msra.mxu1 %v1577_v20 }
 0x2b3   :  { %v424_v52 = vmul.f32 0.0078125, %v409_v49  ;;  %v439_v53 = vmul.f32 %v2015_v44, %v2015_v44  ;;  %1483 = vmatprep.subr.bf16.mxu1 %v1578_v21 }
 0x2b4   :  { %v2023_v56 = vsub.f32 %v401_v25, %v426_v51 }
 0x2b5   :  { %v2021_v54 = vsub.f32 %v399_v26, %v424_v52  ;;  %447 = vadd.xlane.f32.xlu0 %v439_v53  ;;  %v498_v53 = vrot.slane %v2006_v47, %v497_v40 }
 0x2b6   :  { %v415_v55 = vpop.xlane.xlu0 %414  ;;  %v442_v2 = vmul.f32 %v2023_v56, %v2023_v56  ;;  %1484 = vmatpush3.bf16.msra.mxu1 %v1578_v21 }
 0x2b7   :  { %v427_v57 = vmul.f32 0.0078125, %v415_v55  ;;  %v440_v59 = vmul.f32 %v2021_v54, %v2021_v54  ;;  %1485 = vmatprep.subr.bf16.mxu1 %v1579_v22 }
 0x2b8   :  { %v417_v60 = vpop.xlane.xlu1 %416 }
 0x2b9   :  { %v2029_v61 = vsub.f32 %v402_v33, %v427_v57  ;;  %v428_v62 = vmul.f32 0.0078125, %v417_v60  ;;  %451 = vadd.xlane.f32.xlu0 %v441_v58  ;;  %449 = vadd.xlane.f32.xlu1 %v440_v59  ;;  %v509_v58 = vsub.s32 3, %v2003_v45 }
 0x2ba   :  { %v419_v63 = vpop.xlane.xlu0 %418  ;;  %1486 = vmatpush3.bf16.msra.mxu1 %v1579_v22 }
 0x2bb   :  { %v2031_v0 = vsub.f32 %v403_v36, %v428_v62  ;;  %v429_v1 = vmul.f32 0.0078125, %v419_v63  ;;  %v443_v3 = vmul.f32 %v2029_v61, %v2029_v61  ;;  %1487 = vmatprep.subr.bf16.mxu1 %v1580_v23 }
 0x2bc   :  { %v421_v4 = vpop.xlane.xlu1 %420 }
 0x2bd   :  { %v2037_v5 = vsub.f32 %v404_v37, %v429_v1  ;;  %v430_v6 = vmul.f32 0.0078125, %v421_v4  ;;  %453 = vadd.xlane.f32.xlu1 %v442_v2  ;;  %455 = vadd.xlane.f32.xlu0 %v443_v3  ;;  %v444_v8 = vmul.f32 %v2031_v0, %v2031_v0  ;;  %v510_v3 = vrot.slane %v2006_v47, %v509_v58 }
 0x2be   :  { %1488 = vmatpush3.bf16.msra.mxu1 %v1580_v23 }
 0x2bf   :  { %v2039_v7 = vsub.f32 %v405_v38, %v430_v6  ;;  %v445_v9 = vmul.f32 %v2037_v5, %v2037_v5  ;;  %1489 = vmatprep.subr.bf16.mxu1 %v1581_v24 }
 0x2c1   :  { %457 = vadd.xlane.f32.xlu1 %v444_v8  ;;  %459 = vadd.xlane.f32.xlu0 %v445_v9  ;;  %v446_v10 = vmul.f32 %v2039_v7, %v2039_v7 }
 0x2c2   :  { %1490 = vmatpush3.bf16.msra.mxu1 %v1581_v24 }
 0x2c5   :  { %461 = vadd.xlane.f32.xlu1 %v446_v10 }
 0x342   :  { %v448_v25 = vpop.xlane.xlu0 %447 }
 0x343   :  { %v463_v26 = vmul.f32 0.0078125, %v448_v25 }
 0x345   :  { %v471_v27 = vadd.f32 1e-05, %v463_v26 }
 0x346   :  { %v450_v28 = vpop.xlane.xlu1 %449  ;;  %v452_v29 = vpop.xlane.xlu0 %451 }
 0x347   :  { %1592 = vrsqrt.f32 %v471_v27  ;;  %v464_v30 = vmul.f32 0.0078125, %v450_v28  ;;  %v465_v31 = vmul.f32 0.0078125, %v452_v29 }
 0x349   :  { %v472_v32 = vadd.f32 1e-05, %v464_v30  ;;  %v473_v33 = vadd.f32 1e-05, %v465_v31 }
 0x34a   :  { %v454_v34 = vpop.xlane.xlu1 %453  ;;  %v456_v35 = vpop.xlane.xlu0 %455 }
 0x34b   :  { %1594 = vrsqrt.f32 %v472_v32  ;;  %v466_v36 = vmul.f32 0.0078125, %v454_v34  ;;  %v467_v37 = vmul.f32 0.0078125, %v456_v35  ;;  %v541_v32 = vsub.s32 4, %v2003_v45 }
 0x34c   :  { %1596 = vrsqrt.f32 %v473_v33 }
 0x34d   :  { %v474_v38 = vadd.f32 1e-05, %v466_v36  ;;  %v475_v39 = vadd.f32 1e-05, %v467_v37  ;;  %v542_v33 = vrot.slane %v2006_v47, %v541_v32 }
 0x34e   :  { %v458_v41 = vpop.xlane.xlu1 %457  ;;  %v460_v42 = vpop.xlane.xlu0 %459 }
 0x34f   :  { %1598 = vrsqrt.f32 %v474_v38  ;;  %v468_v43 = vmul.f32 0.0078125, %v458_v41  ;;  %v469_v48 = vmul.f32 0.0078125, %v460_v42 }
 0x350   :  { %1600 = vrsqrt.f32 %v475_v39 }
 0x351   :  { %v1593_v49 = vpop.eup %1592  ;;  %v476_v51 = vadd.f32 1e-05, %v468_v43  ;;  %v477_v52 = vadd.f32 1e-05, %v469_v48 }
 0x352   :  { %v462_v55 = vpop.xlane.xlu1 %461  ;;  %v487_v57 = vmul.f32 %v1593_v49, %v2015_v44 }
 0x353   :  { %1602 = vrsqrt.f32 %v476_v51  ;;  %v470_v59 = vmul.f32 0.0078125, %v462_v55 }
 0x354   :  { %1604 = vrsqrt.f32 %v477_v52  ;;  %v499_v2 = vmul.f32 %v498_v53, %v487_v57 }
 0x355   :  { %v1595_v60 = vpop.eup %1594  ;;  %v478_v62 = vadd.f32 1e-05, %v470_v59 }
 0x356   :  { %v1597_v63 = vpop.eup %1596  ;;  %v488_v1 = vmul.f32 %v1595_v60, %v2021_v54  ;;  %v511_v11 = vadd.f32 %v510_v3, %v499_v2 }
 0x357   :  { %v489_v4 = vmul.f32 %v1597_v63, %v2017_v50  ;;  %1606 = vrsqrt.f32 %v478_v62 }
 0x358   :  { %v500_v6 = vmul.f32 %v498_v53, %v488_v1 }
 0x359   :  { %v1599_v8 = vpop.eup %1598  ;;  %v501_v44 = vmul.f32 %v498_v53, %v489_v4 }
 0x35a   :  { %v1601_v9 = vpop.eup %1600  ;;  %v490_v10 = vmul.f32 %v1599_v8, %v2023_v56  ;;  %v512_v12 = vadd.f32 %v510_v3, %v500_v6  ;;  %v686_v8 = vsub.s32 5, %v2003_v45 }
 0x35b   :  { %v491_v14 = vmul.f32 %v1601_v9, %v2029_v61  ;;  %v513_v18 = vadd.f32 %v510_v3, %v501_v44 }
 0x35c   :  { %v502_v15 = vmul.f32 %v498_v53, %v490_v10  ;;  %v519_v16 = vpack.c.bf16 %v512_v12, %v511_v11  ;;  %v687_v9 = vrot.slane %v2006_v47, %v686_v8  ;;  %v1586_v8 = vld [vmem:[#allocation6 + $0x10] sm:$0xff]  }
 0x35d   :  { %v1603_v17 = vpop.eup %1602  ;;  %v503_v20 = vmul.f32 %v498_v53, %v491_v14 }
 0x35e   :  { %v1605_v54 = vpop.eup %1604  ;;  %1471 = vmatprep.mubr.bf16.mxu0 %v519_v16  ;;  %v514_v19 = vadd.f32 %v510_v3, %v502_v15  ;;  %v492_v50 = vmul.f32 %v1603_v17, %v2031_v0  ;;  %v1582_v0 = vld [vmem:[#allocation4 + $0x30] sm:$0xff]  }
 0x35f   :  { %v493_v21 = vmul.f32 %v1605_v54, %v2037_v5  ;;  %v515_v56 = vadd.f32 %v510_v3, %v503_v20  ;;  %1491 = vmatprep.subr.bf16.mxu1 %v1582_v0  ;;  %v1583_v5 = vld [vmem:[#allocation4 + $0x38] sm:$0xff]  }
 0x360   :  { %v520_v22 = vpack.c.bf16 %v514_v19, %v513_v18  ;;  %v504_v23 = vmul.f32 %v498_v53, %v492_v50  ;;  %1492 = vmatpush3.bf16.msra.mxu1 %v1582_v0 }
 0x361   :  { %v1607_v24 = vpop.eup %1606  ;;  %v505_v26 = vmul.f32 %v498_v53, %v493_v21  ;;  %1493 = vmatprep.subr.bf16.mxu1 %v1583_v5 }
 0x362   :  { %1472 = vmatmul.mubr.bf16.vlgmr.msra.gmra.mrb[8].mxu0 %v520_v22  ;;  %v516_v25 = vadd.f32 %v510_v3, %v504_v23  ;;  %v494_v61 = vmul.f32 %v1607_v24, %v2039_v7 }
 0x363   :  { %v517_v29 = vadd.f32 %v510_v3, %v505_v26 }
 0x364   :  { %v521_v27 = vpack.c.bf16 %v516_v25, %v515_v56  ;;  %v506_v28 = vmul.f32 %v498_v53, %v494_v61  ;;  %1494 = vmatpush3.bf16.msra.mxu1 %v1583_v5 }
 0x366   :  { %1475 = vmatprep.mubr.bf16.mxu0 %v521_v27  ;;  %v518_v30 = vadd.f32 %v510_v3, %v506_v28 }
 0x368   :  { %v522_v31 = vpack.c.bf16 %v518_v30, %v517_v29  ;;  %v1584_v30 = vld [vmem:[#allocation6] sm:$0xff]  }
 0x369   :  { %1503 = vmatprep.subr.bf16.mxu0 %v1584_v30  ;;  %1527 = vmatprep.subr.bf16.mxu1 %v1584_v30 }
 0x36a   :  { %1476 = vmatmul.mubr.bf16.gmra.mrb[12].mxu0 %v522_v31 }
 0x36b   :  { %1504 = vmatpush3.bf16.msra.mxu0 %v1584_v30 }
 0x435   :  { %v1473_v34 = vpop.f32.mrb[8].mxu0 }
 0x436   :  { %v634_v7 = vadd.f32 %v1473_v34, %v542_v33  ;;  %v625_v35 = vpop.f32.mrb[9].mxu0 }
 0x437   :  { %v626_v36 = vadd.f32 %v625_v35, %v542_v33  ;;  %v1474_v37 = vpop.f32.mrb[10].mxu0 }
 0x438   :  { %v637_v38 = vadd.f32 %v1474_v37, %v542_v33  ;;  %v628_v39 = vpop.f32.mrb[11].mxu0  ;;  %v658_v41 = vmax.f32 %v634_v7, 0.0 }
 0x439   :  { %v629_v40 = vadd.f32 %v628_v39, %v542_v33  ;;  %v656_v43 = vmax.f32 %v626_v36, 0.0 }
 0x43a   :  { %v659_v42 = vmax.f32 %v637_v38, 0.0 }
 0x43b   :  { %v657_v48 = vmax.f32 %v629_v40, 0.0 }
 0x43c   :  { %v665_v49 = vpack.c.bf16 %v659_v42, %v658_v41 }
 0x43d   :  { %v664_v51 = vpack.c.bf16 %v657_v48, %v656_v43  ;;  %v1477_v52 = vpop.f32.mrb[12].mxu0 }
 0x43e   :  { %v650_v53 = vadd.f32 %v1477_v52, %v542_v33  ;;  %v641_v55 = vpop.f32.mrb[13].mxu0 }
 0x43f   :  { %v642_v57 = vadd.f32 %v641_v55, %v542_v33  ;;  %v1478_v58 = vpop.f32.mrb[14].mxu0  ;;  %1495 = vmatprep.mubr.bf16.mxu1 %v664_v51 }
 0x440   :  { %v653_v59 = vadd.f32 %v1478_v58, %v542_v33  ;;  %v644_v60 = vpop.f32.mrb[15].mxu0  ;;  %1496 = vmatmul.mubr.bf16.vlgmr.msra.gmra.mrb[8].mxu1 %v665_v49  ;;  %v662_v63 = vmax.f32 %v650_v53, 0.0 }
 0x441   :  { %v645_v62 = vadd.f32 %v644_v60, %v542_v33  ;;  %v660_v2 = vmax.f32 %v642_v57, 0.0  ;;  %1535 = vmatpush3.bf16.msra.mxu1 %v1584_v30 }
 0x442   :  { %v663_v1 = vmax.f32 %v653_v59, 0.0 }
 0x443   :  { %v661_v3 = vmax.f32 %v645_v62, 0.0 }
 0x444   :  { %v667_v4 = vpack.c.bf16 %v663_v1, %v662_v63 }
 0x445   :  { %v666_v6 = vpack.c.bf16 %v661_v3, %v660_v2 }
 0x447   :  { %1499 = vmatprep.mubr.bf16.mxu1 %v666_v6  ;;  %v1585_v6 = vld [vmem:[#allocation6 + $0x8] sm:$0xff]  }
 0x448   :  { %1500 = vmatmul.mubr.bf16.gmra.mrb[12].mxu1 %v667_v4  ;;  %1505 = vmatprep.subr.bf16.mxu0 %v1585_v6 }
 0x449   :  { %1528 = vmatprep.subr.bf16.mxu1 %v1585_v6  ;;  %1506 = vmatpush3.bf16.msra.mxu0 %v1585_v6 }
 0x44a   :  { %1536 = vmatpush3.bf16.msra.mxu1 %v1585_v6  ;;  %1507 = vmatprep.subr.bf16.mxu0 %v1586_v8 }
 0x44b   :  { %1529 = vmatprep.subr.bf16.mxu1 %v1586_v8 }
 0x44d   :  { %1508 = vmatpush3.bf16.msra.mxu0 %v1586_v8 }
 0x44e   :  { %1537 = vmatpush3.bf16.msra.mxu1 %v1586_v8 }
 0x513   :  { %v1497_v44 = vpop.f32.mrb[8].mxu1 }
 0x514   :  { %v770_v10 = vpop.f32.mrb[9].mxu1  ;;  %v779_v15 = vadd.f32 %v1497_v44, %v687_v9  ;;  %v1588_v44 = vld [vmem:[#allocation6 + $0x20] sm:$0xff]  }
 0x515   :  { %v771_v11 = vadd.f32 %v770_v10, %v687_v9  ;;  %v1498_v12 = vpop.f32.mrb[10].mxu1  ;;  %v1589_v10 = vld [vmem:[#allocation6 + $0x28] sm:$0xff]  }
 0x516   :  { %v773_v14 = vpop.f32.mrb[11].mxu1  ;;  %v782_v54 = vadd.f32 %v1498_v12, %v687_v9  ;;  %v803_v19 = vmax.f32 %v779_v15, 0.0  ;;  %v1591_v12 = vld [vmem:[#allocation6 + $0x38] sm:$0xff]  }
 0x517   :  { %v801_v16 = vmax.f32 %v771_v11, 0.0  ;;  %v774_v17 = vadd.f32 %v773_v14, %v687_v9  ;;  %v1590_v11 = vld [vmem:[#allocation6 + $0x30] sm:$0xff]  }
 0x518   :  { %v804_v21 = vmax.f32 %v782_v54, 0.0 }
 0x519   :  { %v802_v18 = vmax.f32 %v774_v17, 0.0  ;;  %809 = vadd.xlane.f32.xlu0 %v801_v16 }
 0x51b   :  { %811 = vadd.xlane.f32.xlu1 %v802_v18  ;;  %v1501_v50 = vpop.f32.mrb[12].mxu1 }
 0x51c   :  { %v786_v20 = vpop.f32.mrb[13].mxu1  ;;  %v795_v56 = vadd.f32 %v1501_v50, %v687_v9 }
 0x51d   :  { %v787_v22 = vadd.f32 %v786_v20, %v687_v9  ;;  %813 = vadd.xlane.f32.xlu0 %v803_v19  ;;  %v1502_v23 = vpop.f32.mrb[14].mxu1 }
 0x51e   :  { %v789_v24 = vpop.f32.mrb[15].mxu1  ;;  %v798_v26 = vadd.f32 %v1502_v23, %v687_v9  ;;  %v807_v28 = vmax.f32 %v795_v56, 0.0 }
 0x51f   :  { %v805_v25 = vmax.f32 %v787_v22, 0.0  ;;  %v790_v61 = vadd.f32 %v789_v24, %v687_v9  ;;  %815 = vadd.xlane.f32.xlu1 %v804_v21  ;;  %v1587_v9 = vld [vmem:[#allocation6 + $0x18] sm:$0xff]  }
 0x520   :  { %v808_v29 = vmax.f32 %v798_v26, 0.0  ;;  %1509 = vmatprep.subr.bf16.mxu0 %v1587_v9  ;;  %1530 = vmatprep.subr.bf16.mxu1 %v1587_v9 }
 0x521   :  { %v806_v27 = vmax.f32 %v790_v61, 0.0  ;;  %817 = vadd.xlane.f32.xlu0 %v805_v25  ;;  %1510 = vmatpush3.bf16.msra.mxu0 %v1587_v9 }
 0x522   :  { %1538 = vmatpush3.bf16.msra.mxu1 %v1587_v9  ;;  %1511 = vmatprep.subr.bf16.mxu0 %v1588_v44 }
 0x523   :  { %819 = vadd.xlane.f32.xlu1 %v806_v27  ;;  %1531 = vmatprep.subr.bf16.mxu1 %v1588_v44 }
 0x525   :  { %821 = vadd.xlane.f32.xlu0 %v807_v28  ;;  %1512 = vmatpush3.bf16.msra.mxu0 %v1588_v44 }
 0x526   :  { %1539 = vmatpush3.bf16.msra.mxu1 %v1588_v44  ;;  %1513 = vmatprep.subr.bf16.mxu0 %v1589_v10 }
 0x527   :  { %823 = vadd.xlane.f32.xlu1 %v808_v29  ;;  %1532 = vmatprep.subr.bf16.mxu1 %v1589_v10 }
 0x529   :  { %1514 = vmatpush3.bf16.msra.mxu0 %v1589_v10 }
 0x52a   :  { %1540 = vmatpush3.bf16.msra.mxu1 %v1589_v10  ;;  %1515 = vmatprep.subr.bf16.mxu0 %v1590_v11 }
 0x52b   :  { %1533 = vmatprep.subr.bf16.mxu1 %v1590_v11 }
 0x52d   :  { %1516 = vmatpush3.bf16.msra.mxu0 %v1590_v11 }
 0x52e   :  { %1541 = vmatpush3.bf16.msra.mxu1 %v1590_v11  ;;  %1517 = vmatprep.subr.bf16.mxu0 %v1591_v12 }
 0x52f   :  { %1534 = vmatprep.subr.bf16.mxu1 %v1591_v12 }
 0x531   :  { %1518 = vmatpush3.bf16.msra.mxu0 %v1591_v12 }
 0x532   :  { %1542 = vmatpush3.bf16.msra.mxu1 %v1591_v12 }
 0x5a6   :  { %v810_v31 = vpop.xlane.xlu0 %809 }
 0x5a7   :  { %v825_v0 = vmul.f32 0.0078125, %v810_v31 }
 0x5a8   :  { %v812_v5 = vpop.xlane.xlu1 %811 }
 0x5a9   :  { %v2063_v32 = vsub.f32 %v801_v16, %v825_v0  ;;  %v826_v33 = vmul.f32 0.0078125, %v812_v5  ;;  %v911_v5 = vsub.s32 7, %v2003_v45 }
 0x5aa   :  { %v814_v34 = vpop.xlane.xlu0 %813 }
 0x5ab   :  { %v2065_v7 = vsub.f32 %v802_v18, %v826_v33  ;;  %v827_v35 = vmul.f32 0.0078125, %v814_v34  ;;  %v841_v36 = vmul.f32 %v2063_v32, %v2063_v32 }
 0x5ac   :  { %v816_v37 = vpop.xlane.xlu1 %815 }
 0x5ad   :  { %v2069_v38 = vsub.f32 %v803_v19, %v827_v35  ;;  %v828_v39 = vmul.f32 0.0078125, %v816_v37  ;;  %849 = vadd.xlane.f32.xlu0 %v841_v36  ;;  %v842_v40 = vmul.f32 %v2065_v7, %v2065_v7 }
 0x5ae   :  { %v818_v41 = vpop.xlane.xlu0 %817 }
 0x5af   :  { %v2073_v42 = vsub.f32 %v804_v21, %v828_v39  ;;  %v829_v43 = vmul.f32 0.0078125, %v818_v41  ;;  %851 = vadd.xlane.f32.xlu1 %v842_v40  ;;  %v843_v48 = vmul.f32 %v2069_v38, %v2069_v38 }
 0x5b0   :  { %v820_v49 = vpop.xlane.xlu1 %819 }
 0x5b1   :  { %v2077_v51 = vsub.f32 %v805_v25, %v829_v43  ;;  %v830_v52 = vmul.f32 0.0078125, %v820_v49  ;;  %853 = vadd.xlane.f32.xlu0 %v843_v48  ;;  %v844_v53 = vmul.f32 %v2073_v42, %v2073_v42  ;;  %v899_v25 = vsub.s32 6, %v2003_v45  ;;  %v1073_v45 = vld [vmem:[%s2249_s2 + $0x18] sm:$0xff] }
 0x5b2   :  { %v822_v55 = vpop.xlane.xlu0 %821  ;;  %v912_v43 = vrot.slane %v2006_v47, %v911_v5 }
 0x5b3   :  { %v2081_v57 = vsub.f32 %v806_v27, %v830_v52  ;;  %v831_v58 = vmul.f32 0.0078125, %v822_v55  ;;  %855 = vadd.xlane.f32.xlu1 %v844_v53  ;;  %v845_v59 = vmul.f32 %v2077_v51, %v2077_v51  ;;  %v900_v31 = vrot.slane %v2006_v47, %v899_v25 }
 0x5b4   :  { %v824_v60 = vpop.xlane.xlu1 %823 }
 0x5b5   :  { %v2085_v62 = vsub.f32 %v807_v28, %v831_v58  ;;  %v832_v63 = vmul.f32 0.0078125, %v824_v60  ;;  %857 = vadd.xlane.f32.xlu0 %v845_v59  ;;  %v846_v1 = vmul.f32 %v2081_v57, %v2081_v57 }
 0x5b7   :  { %v2089_v2 = vsub.f32 %v808_v29, %v832_v63  ;;  %859 = vadd.xlane.f32.xlu1 %v846_v1  ;;  %v847_v3 = vmul.f32 %v2085_v62, %v2085_v62 }
 0x5b9   :  { %861 = vadd.xlane.f32.xlu0 %v847_v3  ;;  %v848_v4 = vmul.f32 %v2089_v2, %v2089_v2 }
 0x5bb   :  { %863 = vadd.xlane.f32.xlu1 %v848_v4 }
 0x63a   :  { %v850_v14 = vpop.xlane.xlu0 %849 }
 0x63b   :  { %v865_v15 = vmul.f32 0.0078125, %v850_v14 }
 0x63c   :  { %v852_v16 = vpop.xlane.xlu1 %851 }
 0x63d   :  { %v873_v17 = vadd.f32 1e-05, %v865_v15  ;;  %v866_v54 = vmul.f32 0.0078125, %v852_v16 }
 0x63e   :  { %v854_v18 = vpop.xlane.xlu0 %853 }
 0x63f   :  { %1608 = vrsqrt.f32 %v873_v17  ;;  %v874_v19 = vadd.f32 1e-05, %v866_v54  ;;  %v867_v50 = vmul.f32 0.0078125, %v854_v18 }
 0x640   :  { %v856_v20 = vpop.xlane.xlu1 %855 }
 0x641   :  { %1610 = vrsqrt.f32 %v874_v19  ;;  %v875_v21 = vadd.f32 1e-05, %v867_v50  ;;  %v868_v22 = vmul.f32 0.0078125, %v856_v20 }
 0x642   :  { %v858_v23 = vpop.xlane.xlu0 %857 }
 0x643   :  { %1612 = vrsqrt.f32 %v875_v21  ;;  %v876_v24 = vadd.f32 1e-05, %v868_v22  ;;  %v869_v56 = vmul.f32 0.0078125, %v858_v23  ;;  %v1072_v21 = vld [vmem:[%s2249_s2 + $0x10] sm:$0xff] }
 0x644   :  { %v860_v61 = vpop.xlane.xlu1 %859 }
 0x645   :  { %1614 = vrsqrt.f32 %v876_v24  ;;  %v877_v26 = vadd.f32 1e-05, %v869_v56  ;;  %v870_v27 = vmul.f32 0.0078125, %v860_v61  ;;  %v1070_v56 = vld [vmem:[%s2249_s2] sm:$0xff] }
 0x646   :  { %v862_v28 = vpop.xlane.xlu0 %861 }
 0x647   :  { %1616 = vrsqrt.f32 %v877_v26  ;;  %v878_v29 = vadd.f32 1e-05, %v870_v27  ;;  %v871_v30 = vmul.f32 0.0078125, %v862_v28  ;;  %v1071_v28 = vld [vmem:[%s2249_s2 + $0x8] sm:$0xff] }
 0x648   :  { %v864_v0 = vpop.xlane.xlu1 %863 }
 0x649   :  { %v1609_v33 = vpop.eup %1608  ;;  %1618 = vrsqrt.f32 %v878_v29  ;;  %v879_v34 = vadd.f32 1e-05, %v871_v30  ;;  %v872_v35 = vmul.f32 0.0078125, %v864_v0 }
 0x64a   :  { %v889_v36 = vmul.f32 %v1609_v33, %v2063_v32 }
 0x64b   :  { %v1611_v37 = vpop.eup %1610  ;;  %1620 = vrsqrt.f32 %v879_v34  ;;  %v880_v39 = vadd.f32 1e-05, %v872_v35 }
 0x64c   :  { %v890_v40 = vmul.f32 %v1611_v37, %v2065_v7  ;;  %v901_v41 = vmul.f32 %v900_v31, %v889_v36 }
 0x64d   :  { %v1613_v48 = vpop.eup %1612  ;;  %1622 = vrsqrt.f32 %v880_v39 }
 0x64e   :  { %v891_v49 = vmul.f32 %v1613_v48, %v2069_v38  ;;  %v902_v52 = vmul.f32 %v900_v31, %v890_v40  ;;  %v913_v59 = vadd.f32 %v912_v43, %v901_v41 }
 0x64f   :  { %v1615_v53 = vpop.eup %1614 }
 0x650   :  { %v903_v55 = vmul.f32 %v900_v31, %v891_v49  ;;  %v892_v58 = vmul.f32 %v1615_v53, %v2073_v42  ;;  %v914_v60 = vadd.f32 %v912_v43, %v902_v52 }
 0x651   :  { %v1617_v32 = vpop.eup %1616 }
 0x652   :  { %v904_v63 = vmul.f32 %v900_v31, %v892_v58  ;;  %v921_v1 = vpack.c.bf16 %v914_v60, %v913_v59  ;;  %v893_v3 = vmul.f32 %v1617_v32, %v2077_v51  ;;  %v915_v4 = vadd.f32 %v912_v43, %v903_v55  ;;  %v1074_v55 = vld [vmem:[%s2249_s2 + $0x20] sm:$0xff] }
 0x653   :  { %v1619_v7 = vpop.eup %1618 }
 0x654   :  { %1519 = vmatprep.mubr.bf16.mxu0 %v921_v1  ;;  %v916_v47 = vadd.f32 %v912_v43, %v904_v63  ;;  %v894_v6 = vmul.f32 %v1619_v7, %v2081_v57  ;;  %v905_v8 = vmul.f32 %v900_v31, %v893_v3  ;;  %v91_v57 = vld [vmem:[#allocation7 + $0x8] sm:$0xff]  ;;  %v1077_v63 = vld [vmem:[%s2249_s2 + $0x38] sm:$0xff] }
 0x655   :  { %v1621_v38 = vpop.eup %1620  ;;  %v1061_v19 = vrot.slane %v91_v57, %v283_v13 }
 0x656   :  { %v895_v9 = vmul.f32 %v1621_v38, %v2085_v62  ;;  %v922_v44 = vpack.c.bf16 %v916_v47, %v915_v4  ;;  %v906_v10 = vmul.f32 %v900_v31, %v894_v6  ;;  %v917_v14 = vadd.f32 %v912_v43, %v905_v8  ;;  %v1075_v4 = vld [vmem:[%s2249_s2 + $0x28] sm:$0xff] }
 0x657   :  { %v1623_v42 = vpop.eup %1622  ;;  %v944_v62 = vrot.slane %v91_v57, %v138_v46 }
 0x658   :  { %v907_v11 = vmul.f32 %v900_v31, %v895_v9  ;;  %v896_v12 = vmul.f32 %v1623_v42, %v2089_v2  ;;  %1520 = vmatmul.mubr.bf16.vlgmr.msra.gmra.mrb[16].mxu0 %v922_v44  ;;  %v918_v15 = vadd.f32 %v912_v43, %v906_v10 }
 0x65a   :  { %v908_v51 = vmul.f32 %v900_v31, %v896_v12  ;;  %v923_v16 = vpack.c.bf16 %v918_v15, %v917_v14  ;;  %v919_v17 = vadd.f32 %v912_v43, %v907_v11 }
 0x65c   :  { %1523 = vmatprep.mubr.bf16.mxu1 %v923_v16  ;;  %v920_v54 = vadd.f32 %v912_v43, %v908_v51  ;;  %v1076_v43 = vld [vmem:[%s2249_s2 + $0x30] sm:$0xff]  ;;  %s1780_s2 = smov 118  }
 0x65e   :  { %v924_v18 = vpack.c.bf16 %v920_v54, %v919_v17 }
 0x660   :  { %1524 = vmatmul.mubr.bf16.vlgmr.msra.gmra.mrb[16].mxu1 %v924_v18 }
 0x72b   :  { %v1521_v50 = vpop.f32.mrb[16].mxu0 }
 0x72c   :  { %v1036_v20 = vadd.f32 %v1521_v50, %v944_v62  ;;  %v1027_v2 = vpop.f32.mrb[17].mxu0 }
 0x72d   :  { %v1028_v22 = vadd.f32 %v1027_v2, %v944_v62  ;;  %v1522_v23 = vpop.f32.mrb[18].mxu0 }
 0x72e   :  { %v1064_v24 = vmul.f32 %v1061_v19, %v1036_v20  ;;  %v1039_v25 = vadd.f32 %v1522_v23, %v944_v62  ;;  %v1030_v61 = vpop.f32.mrb[19].mxu0 }
 0x72f   :  { %v1062_v46 = vmul.f32 %v1061_v19, %v1028_v22  ;;  %v1031_v13 = vadd.f32 %v1030_v61, %v944_v62 }
 0x730   :  { %v1080_v26 = vadd.f32 %v1072_v21, %v1064_v24  ;;  %v1065_v27 = vmul.f32 %v1061_v19, %v1039_v25 }
 0x731   :  { %v1078_v29 = vadd.f32 %v1070_v56, %v1062_v46  ;;  %v1063_v30 = vmul.f32 %v1061_v19, %v1031_v13 }
 0x732   :  { %v1331_v31 = vclamps-f32 %v1080_v26, 9.21  ;;  %v1081_v0 = vadd.f32 %v1073_v45, %v1065_v27 }
 0x733   :  { %v1329_v5 = vclamps-f32 %v1078_v29, 9.21  ;;  %v1079_v33 = vadd.f32 %v1071_v28, %v1063_v30  ;;  %v1525_v34 = vpop.f32.mrb[16].mxu1 }
 0x734   :  { %v1339_v35 = vmul.f32 -1.442695, %v1331_v31  ;;  %v1332_v36 = vclamps-f32 %v1081_v0, 9.21  ;;  %v1052_v37 = vadd.f32 %v1525_v34, %v944_v62  ;;  %v1043_v39 = vpop.f32.mrb[17].mxu1 }
 0x735   :  { %v1337_v40 = vmul.f32 -1.442695, %v1329_v5  ;;  %v1330_v41 = vclamps-f32 %v1079_v33, 9.21  ;;  %v1044_v48 = vadd.f32 %v1043_v39, %v944_v62  ;;  %v1526_v49 = vpop.f32.mrb[18].mxu1 }
 0x736   :  { %1624 = vpow2.f32 %v1339_v35  ;;  %v1340_v52 = vmul.f32 -1.442695, %v1332_v36  ;;  %v1068_v53 = vmul.f32 %v1061_v19, %v1052_v37  ;;  %v1055_v58 = vadd.f32 %v1526_v49, %v944_v62  ;;  %v1046_v59 = vpop.f32.mrb[19].mxu1 }
 0x737   :  { %1626 = vpow2.f32 %v1337_v40  ;;  %v1338_v60 = vmul.f32 -1.442695, %v1330_v41  ;;  %v1066_v32 = vmul.f32 %v1061_v19, %v1044_v48  ;;  %v1047_v1 = vadd.f32 %v1046_v59, %v944_v62 }
 0x738   :  { %1628 = vpow2.f32 %v1340_v52  ;;  %v1084_v3 = vadd.f32 %v1076_v43, %v1068_v53  ;;  %v1069_v7 = vmul.f32 %v1061_v19, %v1055_v58 }
 0x739   :  { %1630 = vpow2.f32 %v1338_v60  ;;  %v1082_v47 = vadd.f32 %v1074_v55, %v1066_v32  ;;  %v1067_v6 = vmul.f32 %v1061_v19, %v1047_v1 }
 0x73a   :  { %v1335_v8 = vclamps-f32 %v1084_v3, 9.21  ;;  %v1085_v38 = vadd.f32 %v1077_v63, %v1069_v7 }
 0x73b   :  { %v1333_v9 = vclamps-f32 %v1082_v47, 9.21  ;;  %v1083_v44 = vadd.f32 %v1075_v4, %v1067_v6 }
 0x73c   :  { %v1343_v10 = vmul.f32 -1.442695, %v1335_v8  ;;  %v1336_v42 = vclamps-f32 %v1085_v38, 9.21 }
 0x73d   :  { %v1341_v11 = vmul.f32 -1.442695, %v1333_v9  ;;  %v1334_v12 = vclamps-f32 %v1083_v44, 9.21 }
 0x73e   :  { %1632 = vpow2.f32 %v1343_v10  ;;  %v1344_v14 = vmul.f32 -1.442695, %v1336_v42 }
 0x73f   :  { %1634 = vpow2.f32 %v1341_v11  ;;  %v1342_v15 = vmul.f32 -1.442695, %v1334_v12 }
 0x740   :  { %v1625_v51 = vpop.eup %1624  ;;  %1636 = vpow2.f32 %v1344_v14 }
 0x741   :  { %v1627_v16 = vpop.eup %1626  ;;  %v1128_v17 = vadd.f32 1.0, %v1625_v51  ;;  %1638 = vpow2.f32 %v1342_v15 }
 0x742   :  { %v1629_v54 = vpop.eup %1628  ;;  %v1126_v18 = vadd.f32 1.0, %v1627_v16 }
 0x743   :  { %v1631_v57 = vpop.eup %1630  ;;  %1640 = vrcp.f32 %v1128_v17  ;;  %v1129_v62 = vadd.f32 1.0, %v1629_v54 }
 0x744   :  { %1642 = vrcp.f32 %v1126_v18  ;;  %v1127_v19 = vadd.f32 1.0, %v1631_v57 }
 0x745   :  { %1644 = vrcp.f32 %v1129_v62 }
 0x746   :  { %1646 = vrcp.f32 %v1127_v19 }
 0x748   :  { %v1633_v50 = vpop.eup %1632 }
 0x749   :  { %v1635_v20 = vpop.eup %1634  ;;  %v1132_v2 = vadd.f32 1.0, %v1633_v50 }
 0x74a   :  { %v1637_v21 = vpop.eup %1636  ;;  %v1130_v22 = vadd.f32 1.0, %v1635_v20 }
 0x74b   :  { %v1639_v23 = vpop.eup %1638  ;;  %1648 = vrcp.f32 %v1132_v2  ;;  %v1133_v24 = vadd.f32 1.0, %v1637_v21 }
 0x74c   :  { %1650 = vrcp.f32 %v1130_v22  ;;  %v1131_v56 = vadd.f32 1.0, %v1639_v23 }
 0x74d   :  { %v2135_v25 = vpop.eup %1640  ;;  %1652 = vrcp.f32 %v1133_v24 }
 0x74e   :  { %v2137_v61 = vpop.eup %1642  ;;  %1654 = vrcp.f32 %v1131_v56  ;;  %v1231_v55 = vmul.f32 0.05, %v2135_v25 }
 0x74f   :  { %v2139_v46 = vpop.eup %1644  ;;  %1656 = vrcp.f32 %v2137_v61  ;;  %v1229_v53 = vmul.f32 0.05, %v2137_v61 }
 0x750   :  { %v2142_v45 = vpop.eup %1646  ;;  %1658 = vrcp.f32 %v2135_v25  ;;  %v1232_v59 = vmul.f32 0.05, %v2139_v46 }
 0x751   :  { %1660 = vrcp.f32 %v2142_v45  ;;  %v1230_v52 = vmul.f32 0.05, %v2142_v45 }
 0x752   :  { %1662 = vrcp.f32 %v2139_v46 }
 0x755   :  { %v2147_v13 = vpop.eup %1648 }
 0x756   :  { %v2149_v26 = vpop.eup %1650  ;;  %v1235_v60 = vmul.f32 0.05, %v2147_v13 }
 0x757   :  { %v2151_v27 = vpop.eup %1652  ;;  %1664 = vrcp.f32 %v2149_v26  ;;  %v1233_v58 = vmul.f32 0.05, %v2149_v26 }
 0x758   :  { %v2154_v28 = vpop.eup %1654  ;;  %1666 = vrcp.f32 %v2147_v13  ;;  %v1236_v63 = vmul.f32 0.05, %v2151_v27 }
 0x759   :  { %v1657_v29 = vpop.eup %1656  ;;  %1668 = vrcp.f32 %v2154_v28  ;;  %v1234_v32 = vmul.f32 0.05, %v2154_v28 }
 0x75a   :  { %v1659_v30 = vpop.eup %1658  ;;  %v1167_v31 = vsel %vm1166_vm0, %v1657_v29, 0.0  ;;  %1670 = vrcp.f32 %v2151_v27 }
 0x75b   :  { %v1661_v0 = vpop.eup %1660  ;;  %1168 = vadd.xlane.f32.xlu0 %v1167_v31  ;;  %v1173_v34 = vsel %vm1166_vm0, %v1659_v30, 0.0 }
 0x75c   :  { %v1170_v5 = vsel %vm1166_vm0, %v1661_v0, 0.0  ;;  %v1663_v33 = vpop.eup %1662 }
 0x75d   :  { %1171 = vadd.xlane.f32.xlu1 %v1170_v5  ;;  %v1176_v35 = vsel %vm1166_vm0, %v1663_v33, 0.0 }
 0x75f   :  { %1174 = vadd.xlane.f32.xlu0 %v1173_v34 }
 0x761   :  { %v1665_v36 = vpop.eup %1664  ;;  %1177 = vadd.xlane.f32.xlu1 %v1176_v35 }
 0x762   :  { %v1667_v37 = vpop.eup %1666  ;;  %v1179_v39 = vsel %vm1166_vm0, %v1665_v36, 0.0 }
 0x763   :  { %v1669_v40 = vpop.eup %1668  ;;  %1180 = vadd.xlane.f32.xlu0 %v1179_v39  ;;  %v1185_v48 = vsel %vm1166_vm0, %v1667_v37, 0.0 }
 0x764   :  { %v1182_v41 = vsel %vm1166_vm0, %v1669_v40, 0.0  ;;  %v1671_v43 = vpop.eup %1670 }
 0x765   :  { %1183 = vadd.xlane.f32.xlu1 %v1182_v41  ;;  %v1188_v49 = vsel %vm1166_vm0, %v1671_v43, 0.0 }
 0x767   :  { %1186 = vadd.xlane.f32.xlu0 %v1185_v48 }
 0x769   :  { %1189 = vadd.xlane.f32.xlu1 %v1188_v49 }
 0x77a   :  { %1247 = vrot.lane.b32.xlu1 %v1230_v52, %s1780_s2 }
 0x77d   :  { %1245 = vrot.lane.b32.xlu0 %v1229_v53, %s1780_s2 }
 0x77e   :  { %1249 = vrot.lane.b32.xlu1 %v1231_v55, %s1780_s2 }
 0x781   :  { %1253 = vrot.lane.b32.xlu0 %v1233_v58, %s1780_s2 }
 0x782   :  { %1251 = vrot.lane.b32.xlu1 %v1232_v59, %s1780_s2 }
 0x785   :  { %1257 = vrot.lane.b32.xlu0 %v1235_v60, %s1780_s2 }
 0x786   :  { %1255 = vrot.lane.b32.xlu1 %v1234_v32, %s1780_s2 }
 0x78a   :  { %1259 = vrot.lane.b32.xlu1 %v1236_v63, %s1780_s2 }
 0x7e8   :  { %v1169_v1 = vpop.xlane.xlu0 %1168 }
 0x7ea   :  { %v1172_v3 = vpop.xlane.xlu1 %1171 }
 0x7eb   :  { %v1191_v7 = vadd.f32 %v1172_v3, %v1169_v1 }
 0x7ec   :  { %v1175_v4 = vpop.xlane.xlu0 %1174 }
 0x7ed   :  { %v1192_v47 = vadd.f32 %v1191_v7, %v1175_v4 }
 0x7ee   :  { %v1178_v6 = vpop.xlane.xlu1 %1177 }
 0x7ef   :  { %v1193_v8 = vadd.f32 %v1192_v47, %v1178_v6 }
 0x7f0   :  { %v1181_v38 = vpop.xlane.xlu0 %1180 }
 0x7f1   :  { %v1194_v9 = vadd.f32 %v1193_v8, %v1181_v38 }
 0x7f2   :  { %v1184_v44 = vpop.xlane.xlu1 %1183 }
 0x7f3   :  { %v1195_v10 = vadd.f32 %v1194_v9, %v1184_v44 }
 0x7f4   :  { %v1187_v42 = vpop.xlane.xlu0 %1186 }
 0x7f5   :  { %v1196_v11 = vadd.f32 %v1195_v10, %v1187_v42 }
 0x7f6   :  { %v1190_v12 = vpop.xlane.xlu1 %1189 }
 0x7f7   :  { %v1197_v14 = vadd.f32 %v1196_v11, %v1190_v12 }
 0x7f8   :  { %v1246_v15 = vpop.permute.xlu0 %1245 }
 0x7f9   :  { %v1198_v51 = vrot.slane %v1197_v14, 4  ;;  %1270 = vst.msk [vmem:[%s2257_s10] sm:$0xff] %vm1269_vm1, %v1246_v15 }
 0x7fa   :  { %v1248_v16 = vpop.permute.xlu1 %1247 }
 0x7fb   :  { %v1199_v17 = vadd.f32 %v1198_v51, %v1197_v14  ;;  %1271 = vst.msk [vmem:[%s2257_s10 + $0x8] sm:$0xff] %vm1269_vm1, %v1248_v16 }
 0x7fc   :  { %v1254_v54 = vpop.permute.xlu0 %1253 }
 0x7fd   :  { %v1200_v18 = vrot.slane %v1199_v17, 2  ;;  %1274 = vst.msk [vmem:[%s2257_s10 + $0x20] sm:$0xff] %vm1269_vm1, %v1254_v54 }
 0x7fe   :  { %v1250_v57 = vpop.permute.xlu1 %1249 }
 0x7ff   :  { %v1201_v62 = vadd.f32 %v1200_v18, %v1199_v17  ;;  %1272 = vst.msk [vmem:[%s2257_s10 + $0x10] sm:$0xff] %vm1269_vm1, %v1250_v57 }
 0x800   :  { %v1258_v19 = vpop.permute.xlu0 %1257 }
 0x801   :  { %v1202_v50 = vrot.slane %v1201_v62, 1  ;;  %1276 = vst.msk [vmem:[%s2257_s10 + $0x30] sm:$0xff] %vm1269_vm1, %v1258_v19 }
 0x802   :  { %v1252_v20 = vpop.permute.xlu1 %1251 }
 0x803   :  { %v1203_v2 = vadd.f32 %v1202_v50, %v1201_v62  ;;  %1273 = vst.msk [vmem:[%s2257_s10 + $0x18] sm:$0xff] %vm1269_vm1, %v1252_v20 }
 0x805   :  { %1672 = vrcp.f32 %v1203_v2 }
 0x806   :  { %v1256_v21 = vpop.permute.xlu1 %1255 }
 0x807   :  { %1275 = vst.msk [vmem:[%s2257_s10 + $0x28] sm:$0xff] %vm1269_vm1, %v1256_v21 }
 0x80a   :  { %v1260_v22 = vpop.permute.xlu1 %1259 }
 0x80b   :  { %1277 = vst.msk [vmem:[%s2257_s10 + $0x38] sm:$0xff] %vm1269_vm1, %v1260_v22 }
 0x80f   :  { %v1673_v23 = vpop.eup %1672 }
 0x810   :  { %v1345_v24 = vadd.f32 -6.0, %v1673_v23  ;;  %v1210_v29 = vmax.f32 %v1673_v23, 1e-08 }
 0x812   :  { %v1207_v56 = vmul.f32 1.442695, %v1345_v24 }
 0x814   :  { %1674 = vpow2.f32 %v1207_v56 }
 0x815   :  { %1676 = vrcp.f32 %v1210_v29 }
 0x81e   :  { %v1675_v30 = vpop.eup %1674 }
 0x81f   :  { %v1346_v31 = vadd.f32 -0.0024787523, %v1675_v30  ;;  %v1677_v0 = vpop.eup %1676 }
 0x821   :  { %v1212_v5 = vmul.f32 %v1677_v0, %v1346_v31 }
 0x823   :  { %v1213_v33 = vmul.f32 %v2137_v61, %v1212_v5  ;;  %v1214_v34 = vmul.f32 %v2142_v45, %v1212_v5  ;;  %v1215_v35 = vmul.f32 %v2135_v25, %v1212_v5  ;;  %v1216_v36 = vmul.f32 %v2139_v46, %v1212_v5 }
 0x824   :  { %v1217_v37 = vmul.f32 %v2149_v26, %v1212_v5  ;;  %v1218_v39 = vmul.f32 %v2154_v28, %v1212_v5  ;;  %v1219_v40 = vmul.f32 %v2147_v13, %v1212_v5  ;;  %v1220_v41 = vmul.f32 %v2151_v27, %v1212_v5 }
 0x825   :  { %1221 = vst.msk [vmem:[%s2256_s9] sm:$0xff] %vm1166_vm0, %v1213_v33  ;;  %1222 = vst.msk [vmem:[%s2256_s9 + $0x8] sm:$0xff] %vm1166_vm0, %v1214_v34 }
 0x826   :  { %1223 = vst.msk [vmem:[%s2256_s9 + $0x10] sm:$0xff] %vm1166_vm0, %v1215_v35  ;;  %1224 = vst.msk [vmem:[%s2256_s9 + $0x18] sm:$0xff] %vm1166_vm0, %v1216_v36 }
 0x827   :  { %1225 = vst.msk [vmem:[%s2256_s9 + $0x20] sm:$0xff] %vm1166_vm0, %v1217_v37  ;;  %1226 = vst.msk [vmem:[%s2256_s9 + $0x28] sm:$0xff] %vm1166_vm0, %v1218_v39 }
 0x828   :  { %1227 = vst.msk [vmem:[%s2256_s9 + $0x30] sm:$0xff] %vm1166_vm0, %v1219_v40  ;;  %1228 = vst.msk [vmem:[%s2256_s9 + $0x38] sm:$0xff] %vm1166_vm0, %v1220_v41 }
 0x829   :  { %1286 = vsyncpa [#allocation3], 1 }
 0x82a   :  { %1287 = vsyncpa [#allocation5], 1 }
 0x82b   :  { %1288 = vsyncpa [#allocation8], 1 }

</bundles_post_ra>
